<compile_context>
chip_gen: v5e
topology: v5e:2x2
jax: 0.10.0
libtpu: 0.0.40
codegen_flags: <defaults>
</compile_context>

<pallas_src>
import jax
import jax.numpy as jnp
from jax.experimental import pallas as pl
from jax.experimental.pallas import tpu as pltpu

IN_FEATURES = 784
HIDDEN = 800
N_CLASSES = 10
OUT_PAD = 128      # lane-dense padded class width
TM_MAX = 512       # batch-tile rows per grid step (same policy on v5e/v6e/v7x)
M_CHUNK = 256      # in-kernel row-chunk size for MXU/VPU overlap


def bobnet_kernel(x_ref, w1_ref, b1_ref, w2_ref, b2_ref, o_ref):
    tm = x_ref.shape[0]
    b1 = b1_ref[...]                      # (1, HIDDEN)  f32
    b2 = b2_ref[...]                      # (1, OUT_PAD) f32

    # Chunk the tile over rows (M).  Chunks are independent, so the scheduler
    # can hide chunk n's bias/relu/cast/softmax (VPU + EUP work) under
    # chunk n+1's MXU pushes.
    for start in range(0, tm, M_CHUNK):
        size = min(M_CHUNK, tm - start)
        xs = x_ref[pl.ds(start, size), :].astype(jnp.bfloat16)

        # fc1 (bf16 in, f32 accumulate) + bias + relu, recast to bf16 for fc2
        h = jnp.dot(xs, w1_ref[...], preferred_element_type=jnp.float32)
        h = jnp.maximum(h + b1, 0.0).astype(jnp.bfloat16)            # (size, 800)

        # fc2 on the padded (800, 128) slab; pad cols: 0 weights, -1e30 bias
        logits = jnp.dot(h, w2_ref[...],
                         preferred_element_type=jnp.float32) + b2    # (size, 128)

        # numerically stable softmax; padded columns give exp(...) == 0 exactly
        m = jnp.max(logits, axis=-1, keepdims=True)
        e = jnp.exp(logits - m)
        denom = jnp.sum(e, axis=-1, keepdims=True)
        probs = e * pl.reciprocal(denom, approx=True)                # EUP fast path
        o_ref[pl.ds(start, size), :] = probs.astype(o_ref.dtype)


def _round_up(n, m):
    return ((n + m - 1) // m) * m


def _pick_tm(batch, tm_max=TM_MAX):
    """Batch-tile size.  Single full-batch block when it fits; otherwise tiles
    of <= tm_max rows with an even number of grid steps so v7x's two
    TensorCores both get work under dimension_semantics=("parallel",)."""
    if batch <= tm_max:
        return batch                       # block dim == array dim (always legal)
    steps = -(-batch // tm_max)            # cdiv
    if steps % 2:
        steps += 1                         # even grid length for megacore
    return _round_up(-(-batch // steps), 8)


def prepare_bobnet_params(w1, b1, w2, b2):
    """One-time layout prep (hoisted so transposes/casts/padding are not
    re-executed per forward call).  PyTorch Linear conventions:
    w1 (800, 784), b1 (800,), w2 (10, 800), b2 (10,)."""
    w1_t = w1.T.astype(jnp.bfloat16)                       # (784, 800) bf16
    b1_r = b1.reshape(1, -1).astype(jnp.float32)           # (1, 800)   f32
    # lane-dense padded fc2: zero weights / -1e30 bias for the 118 pad columns
    w2_p = jnp.zeros((HIDDEN, OUT_PAD), jnp.bfloat16)
    w2_p = w2_p.at[:, :N_CLASSES].set(w2.T.astype(jnp.bfloat16))
    b2_p = jnp.full((1, OUT_PAD), -1e30, jnp.float32)
    b2_p = b2_p.at[0, :N_CLASSES].set(b2.astype(jnp.float32))
    return w1_t, b1_r, w2_p, b2_p


def bobnet_forward(x_nchw, params, *, tm=None):
    """x_nchw: (B, 1, 28, 28) f32.  Returns (B, 10) softmax probabilities (f32)."""
    w1_t, b1_r, w2_p, b2_p = params
    B = x_nchw.shape[0]
    if tm is None:
        tm = _pick_tm(B)

    # nn.Flatten (row-major, matches PyTorch; contiguous reshape is free).
    # No bf16 cast / batch pad here: cast happens in-kernel, ragged last grid
    # block is masked by Pallas.
    x = x_nchw.reshape(B, -1)

    out = pl.pallas_call(
        bobnet_kernel,
        out_shape=jax.ShapeDtypeStruct((B, OUT_PAD), jnp.float32),
        grid_spec=pltpu.PrefetchScalarGridSpec(
            num_scalar_prefetch=0,
            grid=(pl.cdiv(B, tm),),
            in_specs=[
                pl.BlockSpec((tm, IN_FEATURES), lambda i: (i, 0)),      # x tile (pipelined)
                pl.BlockSpec((IN_FEATURES, HIDDEN), lambda i: (0, 0)),  # w1 (VMEM-resident)
                pl.BlockSpec((1, HIDDEN), lambda i: (0, 0)),            # b1 (resident)
                pl.BlockSpec((HIDDEN, OUT_PAD), lambda i: (0, 0)),      # w2 (resident)
                pl.BlockSpec((1, OUT_PAD), lambda i: (0, 0)),           # b2 (resident)
            ],
            out_specs=pl.BlockSpec((tm, OUT_PAD), lambda i: (i, 0)),
        ),
        compiler_params=pltpu.CompilerParams(
            dimension_semantics=("parallel",),   # batch tiles independent (v7x megacore)
        ),
    )(x, w1_t, b1_r, w2_p, b2_p)

    return out[:, :N_CLASSES]


def _reference_f32(x_nchw, w1, b1, w2, b2):
    x = x_nchw.reshape(x_nchw.shape[0], -1)
    h = jnp.maximum(x @ w1.T + b1, 0.0)
    return jax.nn.softmax(h @ w2.T + b2, axis=1)


def _reference_bf16(x_nchw, w1, b1, w2, b2):
    # Same bf16-matmul-input / f32-accumulate recipe as the kernel (exact divide).
    x = x_nchw.reshape(x_nchw.shape[0], -1).astype(jnp.bfloat16)
    h = jnp.dot(x, w1.T.astype(jnp.bfloat16),
                preferred_element_type=jnp.float32) + b1
    h = jnp.maximum(h, 0.0).astype(jnp.bfloat16)
    logits = jnp.dot(h, w2.T.astype(jnp.bfloat16),
                     preferred_element_type=jnp.float32) + b2
    return jax.nn.softmax(logits, axis=1)


if __name__ == "__main__":
    key = jax.random.PRNGKey(0)
    kx, k1, k2, k3, k4 = jax.random.split(key, 5)

    # PyTorch Linear parameter shapes: (out_features, in_features)
    w1 = jax.random.uniform(k1, (HIDDEN, IN_FEATURES), jnp.float32, -0.03, 0.03)
    b1 = jax.random.uniform(k2, (HIDDEN,), jnp.float32, -0.03, 0.03)
    w2 = jax.random.uniform(k3, (N_CLASSES, HIDDEN), jnp.float32, -0.03, 0.03)
    b2 = jax.random.uniform(k4, (N_CLASSES,), jnp.float32, -0.03, 0.03)

    params = prepare_bobnet_params(w1, b1, w2, b2)

    # B=8:    single grid step, single M-chunk.
    # B=300:  single grid step, two M-chunks (256 + 44).
    # B=1100: multi-step grid (even #steps) with a ragged (masked) last block.
    for B in (8, 300, 1100):
        x = jax.random.normal(jax.random.fold_in(kx, B), (B, 1, 28, 28),
                              dtype=jnp.float32)
        out = jax.block_until_ready(bobnet_forward(x, params))
        assert out.shape == (B, N_CLASSES)

        # exact-recipe check (bf16 matmul inputs, f32 accumulation); tolerance
        # loosened to cover the EUP approximate reciprocal in the softmax.
        ref_m = _reference_bf16(x, w1, b1, w2, b2)
        assert jnp.allclose(out, ref_m, atol=2e-3, rtol=2e-3), \
            f"mismatch vs bf16-matched reference at B={B}"

        # semantics check vs the pure-f32 PyTorch-equivalent forward
        ref_f = _reference_f32(x, w1, b1, w2, b2)
        assert jnp.allclose(out, ref_f, atol=1.5e-2), \
            f"mismatch vs f32 reference at B={B}"

        # softmax rows sum to ~1 (padded classes contribute exactly 0)
        assert jnp.allclose(jnp.sum(out, axis=1), 1.0, atol=1e-2)

    print("KERNEL_OK")
</pallas_src>

<mosaic_0001>
module attributes {stable_mosaic.version = 11 : i64} {
  func.func @bobnet_kernel(%arg0: i32, %arg1: memref<8x784xf32, #tpu.memory_space<vmem>>, %arg2: memref<784x800xbf16, #tpu.memory_space<vmem>>, %arg3: memref<1x800xf32, #tpu.memory_space<vmem>>, %arg4: memref<800x128xbf16, #tpu.memory_space<vmem>>, %arg5: memref<1x128xf32, #tpu.memory_space<vmem>>, %arg6: memref<8x128xf32, #tpu.memory_space<vmem>>) attributes {dimension_semantics = [#tpu.dimension_semantics<parallel>], iteration_bounds = array<i64: 1>, scalar_prefetch = 0 : i64, scratch_operands = 0 : i64, tpu.core_type = #tpu.core_type<tc>, window_params = [{transform_indices = @transform_0, window_bounds = array<i64: 8, 784>}, {pipeline_mode = #tpu.pipeline_mode<synchronous>, transform_indices = @transform_1, window_bounds = array<i64: 784, 800>}, {pipeline_mode = #tpu.pipeline_mode<synchronous>, transform_indices = @transform_2, window_bounds = array<i64: 1, 800>}, {pipeline_mode = #tpu.pipeline_mode<synchronous>, transform_indices = @transform_3, window_bounds = array<i64: 800, 128>}, {pipeline_mode = #tpu.pipeline_mode<synchronous>, transform_indices = @transform_4, window_bounds = array<i64: 1, 128>}, {transform_indices = @transform_5, window_bounds = array<i64: 8, 128>}]} {
    %c0 = arith.constant 0 : index
    %c0_0 = arith.constant 0 : index
    %0 = vector.load %arg3[%c0, %c0_0] : memref<1x800xf32, #tpu.memory_space<vmem>>, vector<1x800xf32>
    %c0_1 = arith.constant 0 : index
    %c0_2 = arith.constant 0 : index
    %1 = vector.load %arg5[%c0_1, %c0_2] : memref<1x128xf32, #tpu.memory_space<vmem>>, vector<1x128xf32>
    %c0_3 = arith.constant 0 : index
    %c0_4 = arith.constant 0 : index
    %2 = vector.load %arg1[%c0_3, %c0_4] : memref<8x784xf32, #tpu.memory_space<vmem>>, vector<8x784xf32>
    %3 = arith.truncf %2 : vector<8x784xf32> to vector<8x784xbf16>
    %c0_5 = arith.constant 0 : index
    %c0_6 = arith.constant 0 : index
    %4 = vector.load %arg2[%c0_5, %c0_6] : memref<784x800xbf16, #tpu.memory_space<vmem>>, vector<784x800xbf16>
    %cst = arith.constant dense<0.000000e+00> : vector<8x800xf32>
    %5 = tpu.matmul %3, %4, %cst {dimension_numbers = #tpu.dot_dimension_numbers<[1], [0], [0], [1], [0, 0, 1, 1], [], []>} : vector<8x784xbf16>, vector<784x800xbf16>, vector<8x800xf32> -> vector<8x800xf32>
    %6 = vector.broadcast %0 : vector<1x800xf32> to vector<8x800xf32>
    %7 = arith.addf %5, %6 : vector<8x800xf32>
    %cst_7 = arith.constant 0.000000e+00 : f32
    %8 = vector.broadcast %cst_7 : f32 to vector<8x800xf32>
    %9 = arith.maximumf %7, %8 : vector<8x800xf32>
    %10 = arith.truncf %9 : vector<8x800xf32> to vector<8x800xbf16>
    %c0_8 = arith.constant 0 : index
    %c0_9 = arith.constant 0 : index
    %11 = vector.load %arg4[%c0_8, %c0_9] : memref<800x128xbf16, #tpu.memory_space<vmem>>, vector<800x128xbf16>
    %cst_10 = arith.constant dense<0.000000e+00> : vector<8x128xf32>
    %12 = tpu.matmul %10, %11, %cst_10 {dimension_numbers = #tpu.dot_dimension_numbers<[1], [0], [0], [1], [0, 0, 1, 1], [], []>} : vector<8x800xbf16>, vector<800x128xbf16>, vector<8x128xf32> -> vector<8x128xf32>
    %13 = vector.broadcast %1 : vector<1x128xf32> to vector<8x128xf32>
    %14 = arith.addf %12, %13 : vector<8x128xf32>
    %cst_11 = arith.constant dense<0xFF800000> : vector<8xf32>
    %15 = vector.multi_reduction <maximumf>, %14, %cst_11 [1] : vector<8x128xf32> to vector<8xf32>
    %16 = vector.shape_cast %15 : vector<8xf32> to vector<8x1xf32>
    %17 = vector.broadcast %16 : vector<8x1xf32> to vector<8x128xf32>
    %18 = arith.subf %14, %17 : vector<8x128xf32>
    %19 = math.exp %18 : vector<8x128xf32>
    %cst_12 = arith.constant dense<0.000000e+00> : vector<8xf32>
    %20 = vector.multi_reduction <add>, %19, %cst_12 [1] : vector<8x128xf32> to vector<8xf32>
    %21 = vector.shape_cast %20 : vector<8xf32> to vector<8x1xf32>
    %22 = tpu.reciprocal %21 {approx = true} : vector<8x1xf32> -> vector<8x1xf32>
    %23 = vector.broadcast %22 : vector<8x1xf32> to vector<8x128xf32>
    %24 = arith.mulf %19, %23 : vector<8x128xf32>
    %c0_13 = arith.constant 0 : index
    %c0_14 = arith.constant 0 : index
    %25 = vector.load %arg6[%c0_13, %c0_14] : memref<8x128xf32, #tpu.memory_space<vmem>>, vector<8x128xf32>
    tpu.vector_store %arg6[%c0_13, %c0_14], %24 {strides = array<i32>} : memref<8x128xf32, #tpu.memory_space<vmem>>, vector<8x128xf32>,
    return
  }
  func.func @transform_0(%arg0: i32) -> (i32, i32) {
    %c0_i32 = arith.constant 0 : i32
    %c0_i32_0 = arith.constant 0 : i32
    return %arg0, %c0_i32 : i32, i32
  }
  func.func @transform_1(%arg0: i32) -> (i32, i32) {
    %c0_i32 = arith.constant 0 : i32
    %c0_i32_0 = arith.constant 0 : i32
    %c0_i32_1 = arith.constant 0 : i32
    return %c0_i32, %c0_i32_0 : i32, i32
  }
  func.func @transform_2(%arg0: i32) -> (i32, i32) {
    %c0_i32 = arith.constant 0 : i32
    %c0_i32_0 = arith.constant 0 : i32
    %c0_i32_1 = arith.constant 0 : i32
    return %c0_i32, %c0_i32_0 : i32, i32
  }
  func.func @transform_3(%arg0: i32) -> (i32, i32) {
    %c0_i32 = arith.constant 0 : i32
    %c0_i32_0 = arith.constant 0 : i32
    %c0_i32_1 = arith.constant 0 : i32
    return %c0_i32, %c0_i32_0 : i32, i32
  }
  func.func @transform_4(%arg0: i32) -> (i32, i32) {
    %c0_i32 = arith.constant 0 : i32
    %c0_i32_0 = arith.constant 0 : i32
    %c0_i32_1 = arith.constant 0 : i32
    return %c0_i32, %c0_i32_0 : i32, i32
  }
  func.func @transform_5(%arg0: i32) -> (i32, i32) {
    %c0_i32 = arith.constant 0 : i32
    %c0_i32_0 = arith.constant 0 : i32
    return %arg0, %c0_i32 : i32, i32
  }
}

</mosaic_0001>

<bundles_post_ra>
// kernel: tpu_custom_call.1
= control target key start
LH: loop header
LB: loop body
LE: loop exit
PB: predicated region body
PF: predicated region fallthrough
CT: control target
= control target key end

     0   :  { %10 = vsyncpa [#allocation3], 0  ;;  %s5788_s0 = inlined_call_operand.hbm [shape: f32[8,784], index: 0, kind: input, shape index: {}]   ;;  %s5789_s1 = inlined_call_operand.hbm [shape: bf16[784,800], index: 1, kind: input, shape index: {}]   ;;  %s5790_s2 = inlined_call_operand.hbm [shape: f32[1,800], index: 2, kind: input, shape index: {}]   ;;  %s5791_s3 = inlined_call_operand.hbm [shape: bf16[800,128], index: 3, kind: input, shape index: {}]   ;;  %s5792_s4 = inlined_call_operand.hbm [shape: f32[1,128], index: 4, kind: input, shape index: {}]   ;;  %s5793_s5 = inlined_call_operand.hbm [shape: f32[8,128], index: 5, kind: output, shape index: {}]  }
   0x1   :  { %11 = vsyncpa [#allocation6], 0 }
   0x2   :  { %12 = vsyncpa [#allocation9], 0  ;;  %s29_s20 = sshll.u32 %s5789_s1, 4  ;;  %s30_s20 = int_to_ptr.hbm [resolvable:$true] %s29_s20 }
   0x3   :  { %13 = vsyncpa [#allocation4], 0  ;;  %s5604_s21 = smov [#allocation5]   ;;  %s53_s25 = sshll.u32 %s5791_s3, 4  ;;  %s54_s25 = int_to_ptr.hbm [resolvable:$true] %s53_s25 }
   0x4   :  { %s31_s22 = sshll.u32 %s5604_s21, 4  ;;  %s5605_s26 = smov 448   ;;  %s32_s22 = int_to_ptr.vmem [resolvable:$true] %s31_s22 }
   0x5   :  { %s5606_s27 = smov 28   ;;  %s5607_s28 = smov [#allocation8]  }
   0x6   :  { %37 = dma.hbm_to_vmem [thread:$0]  %s30_s20, 43904, %s32_s22, [#allocation6], %s5605_s26, %s5605_s26, %s5606_s27  }
   0x7   :  { %s55_s29 = sshll.u32 %s5607_s28, 4  ;;  %s5608_s30 = smov 64   ;;  %s56_s29 = int_to_ptr.vmem [resolvable:$true] %s55_s29 }
   0x8   :  { %s5609_s6 = smov 4   ;;  %s19_s8 = sshll.u32 %s5788_s0, 4  ;;  %s20_s8 = int_to_ptr.hbm [resolvable:$true] %s19_s8 }
   0x9   :  { %61 = dma.hbm_to_vmem [thread:$0]  %s54_s25, 6400, %s56_s29, [#allocation9], %s5608_s30, %s5608_s30, %s5609_s6  }
   0xa   :  { %s5610_s9 = smov [#allocation2]   ;;  %s43_s12 = sshll.u32 %s5790_s2, 4  ;;  %s44_s12 = int_to_ptr.hbm [resolvable:$true] %s43_s12 }
   0xb   :  { %s21_s10 = sshll.u32 %s5610_s9, 4  ;;  %s5611_s13 = smov [#allocation7]   ;;  %s22_s10 = int_to_ptr.vmem [resolvable:$true] %s21_s10 }
   0xc   :  { %24 = dma.hbm_to_vmem [thread:$0]  %s20_s8, 896, %s22_s10, [#allocation3]  }
   0xd   :  { %s45_s14 = sshll.u32 %s5611_s13, 4  ;;  %s67_s17 = sshll.u32 %s5792_s4, 4  ;;  %s46_s14 = int_to_ptr.vmem [resolvable:$true] %s45_s14  ;;  %s68_s17 = int_to_ptr.hbm [resolvable:$true] %s67_s17 }
   0xe   :  { %48 = dma.hbm_to_vmem [thread:$0]  %s44_s12, 112, %s46_s14, [#allocation6]  }
   0xf   :  { %s5612_s0 = smov [#allocation10]  }
  0x10   :  { %s69_s18 = sshll.u32 %s5612_s0, 4  ;;  %s70_s18 = int_to_ptr.vmem [resolvable:$true] %s69_s18 }
  0x11   :  { %72 = dma.hbm_to_vmem [thread:$0]  %s68_s17, 16, %s70_s18, [#allocation9]  }
  0x12   :  { %5596 = dma.done.wait [#allocation3], 896  }
  0x13   :  { %5597 = vsyncadd [#allocation3], 4294966400 }
  0x14   :  { %5598 = dma.done.wait [#allocation6], 44016  }
  0x15   :  { %5599 = vsyncadd [#allocation6], 4294923280 }
  0x16   :  { %5600 = dma.done.wait [#allocation9], 6416  }
  0x17   :  { %5601 = vsyncadd [#allocation9], 4294960880  ;;  %v3661_v0 = vld [vmem:[#allocation5 + $0x188] sm:$0xf]  ;;  %v5095_v1 = vld [vmem:[#allocation5 + $0x1a0] sm:$0xf0] }
  0x18   :  { %v3885_v2 = vld [vmem:[#allocation5 + $0x348] sm:$0xf]  ;;  %v3662_v3 = vor.u32 %v5095_v1, %v3661_v0  ;;  %v5151_v4 = vld [vmem:[#allocation5 + $0x360] sm:$0xf0]  ;;  %v3633_v11 = vld [vmem:[#allocation5 + $0x150] sm:$0xf] }
  0x19   :  { %v4109_v5 = vld [vmem:[#allocation5 + $0x508] sm:$0xf]  ;;  %v5207_v6 = vld [vmem:[#allocation5 + $0x520] sm:$0xf0]  ;;  %v3886_v7 = vor.u32 %v5151_v4, %v3885_v2  ;;  %v5088_v13 = vld [vmem:[#allocation5 + $0x168] sm:$0xf0] }
  0x1a   :  { %v4110_v8 = vor.u32 %v5207_v6, %v4109_v5  ;;  %v4333_v9 = vld [vmem:[#allocation5 + $0x6c8] sm:$0xf]  ;;  %v5263_v10 = vld [vmem:[#allocation5 + $0x6e0] sm:$0xf0]  ;;  %2285 = vmatpush.bf16.msra.mxu0 %v3662_v3  ;;  %v3857_v14 = vld [vmem:[#allocation5 + $0x310] sm:$0xf]  ;;  %v3634_v16 = vor.u32 %v5088_v13, %v3633_v11 }
  0x1b   :  { %v4334_v12 = vor.u32 %v5263_v10, %v4333_v9  ;;  %v5144_v15 = vld [vmem:[#allocation5 + $0x328] sm:$0xf0]  ;;  %2298 = vmatpush.bf16.msra.mxu1 %v3886_v7  ;;  %v4081_v18 = vld [vmem:[#allocation5 + $0x4d0] sm:$0xf]  ;;  %v3605_v23 = vld [vmem:[#allocation5 + $0x118] sm:$0xf] }
  0x1c   :  { %2311 = vmatpush.bf16.msra.mxu2 %v4110_v8  ;;  %v3858_v17 = vor.u32 %v5144_v15, %v3857_v14  ;;  %v5200_v19 = vld [vmem:[#allocation5 + $0x4e8] sm:$0xf0]  ;;  %v4305_v20 = vld [vmem:[#allocation5 + $0x690] sm:$0xf]  ;;  %v5081_v24 = vld [vmem:[#allocation5 + $0x130] sm:$0xf0] }
  0x1d   :  { %2324 = vmatpush.bf16.msra.mxu3 %v4334_v12  ;;  %v4082_v21 = vor.u32 %v5200_v19, %v4081_v18  ;;  %v5256_v22 = vld [vmem:[#allocation5 + $0x6a8] sm:$0xf0]  ;;  %v3829_v26 = vld [vmem:[#allocation5 + $0x2d8] sm:$0xf]  ;;  %v5137_v27 = vld [vmem:[#allocation5 + $0x2f0] sm:$0xf0]  ;;  %v3606_v29 = vor.u32 %v5081_v24, %v3605_v23 }
  0x1e   :  { %v4306_v25 = vor.u32 %v5256_v22, %v4305_v20  ;;  %v4053_v28 = vld [vmem:[#allocation5 + $0x498] sm:$0xf]  ;;  %2286 = vmatpush.bf16.msra.mxu0 %v3634_v16  ;;  %v5193_v30 = vld [vmem:[#allocation5 + $0x4b0] sm:$0xf0]  ;;  %v3830_v33 = vor.u32 %v5137_v27, %v3829_v26  ;;  %v3577_v35 = vld [vmem:[#allocation5 + $0xe0] sm:$0xf] }
  0x1f   :  { %v4277_v31 = vld [vmem:[#allocation5 + $0x658] sm:$0xf]  ;;  %v5249_v32 = vld [vmem:[#allocation5 + $0x670] sm:$0xf0]  ;;  %2299 = vmatpush.bf16.msra.mxu1 %v3858_v17  ;;  %v4054_v34 = vor.u32 %v5193_v30, %v4053_v28  ;;  %v5074_v36 = vld [vmem:[#allocation5 + $0xf8] sm:$0xf0] }
  0x20   :  { %2312 = vmatpush.bf16.msra.mxu2 %v4082_v21  ;;  %v3801_v37 = vld [vmem:[#allocation5 + $0x2a0] sm:$0xf]  ;;  %v4278_v38 = vor.u32 %v5249_v32, %v4277_v31  ;;  %v5130_v39 = vld [vmem:[#allocation5 + $0x2b8] sm:$0xf0]  ;;  %v3578_v44 = vor.u32 %v5074_v36, %v3577_v35  ;;  %v3549_v47 = vld [vmem:[#allocation5 + $0xa8] sm:$0xf] }
  0x21   :  { %2325 = vmatpush.bf16.msra.mxu3 %v4306_v25  ;;  %v4025_v40 = vld [vmem:[#allocation5 + $0x460] sm:$0xf]  ;;  %v5186_v41 = vld [vmem:[#allocation5 + $0x478] sm:$0xf0]  ;;  %v3802_v45 = vor.u32 %v5130_v39, %v3801_v37  ;;  %v5067_v48 = vld [vmem:[#allocation5 + $0xc0] sm:$0xf0] }
  0x22   :  { %v4249_v42 = vld [vmem:[#allocation5 + $0x620] sm:$0xf]  ;;  %v5242_v43 = vld [vmem:[#allocation5 + $0x638] sm:$0xf0]  ;;  %2287 = vmatpush.bf16.msra.mxu0 %v3606_v29  ;;  %v4026_v46 = vor.u32 %v5186_v41, %v4025_v40  ;;  %v3773_v49 = vld [vmem:[#allocation5 + $0x268] sm:$0xf]  ;;  %v3550_v56 = vor.u32 %v5067_v48, %v3549_v47 }
  0x23   :  { %2300 = vmatpush.bf16.msra.mxu1 %v3830_v33  ;;  %v4250_v50 = vor.u32 %v5242_v43, %v4249_v42  ;;  %v5123_v51 = vld [vmem:[#allocation5 + $0x280] sm:$0xf0]  ;;  %v3997_v52 = vld [vmem:[#allocation5 + $0x428] sm:$0xf]  ;;  %v3521_v59 = vld [vmem:[#allocation5 + $0x70] sm:$0xf] }
  0x24   :  { %2313 = vmatpush.bf16.msra.mxu2 %v4054_v34  ;;  %v5179_v53 = vld [vmem:[#allocation5 + $0x440] sm:$0xf0]  ;;  %v4221_v54 = vld [vmem:[#allocation5 + $0x5e8] sm:$0xf]  ;;  %v3774_v57 = vor.u32 %v5123_v51, %v3773_v49  ;;  %v5060_v60 = vld [vmem:[#allocation5 + $0x88] sm:$0xf0] }
  0x25   :  { %2326 = vmatpush.bf16.msra.mxu3 %v4278_v38  ;;  %v5235_v55 = vld [vmem:[#allocation5 + $0x600] sm:$0xf0]  ;;  %v3998_v58 = vor.u32 %v5179_v53, %v3997_v52  ;;  %v3745_v61 = vld [vmem:[#allocation5 + $0x230] sm:$0xf]  ;;  %v5116_v63 = vld [vmem:[#allocation5 + $0x248] sm:$0xf0]  ;;  %v3522_v4 = vor.u32 %v5060_v60, %v3521_v59 }
  0x26   :  { %2288 = vmatpush.bf16.msra.mxu0 %v3578_v44  ;;  %v4222_v62 = vor.u32 %v5235_v55, %v4221_v54  ;;  %v3969_v0 = vld [vmem:[#allocation5 + $0x3f0] sm:$0xf]  ;;  %v5172_v1 = vld [vmem:[#allocation5 + $0x408] sm:$0xf0]  ;;  %v3746_v5 = vor.u32 %v5116_v63, %v3745_v61  ;;  %v3493_v7 = vld [vmem:[#allocation5 + $0x38] sm:$0xf] }
  0x27   :  { %2301 = vmatpush.bf16.msra.mxu1 %v3802_v45  ;;  %v4193_v2 = vld [vmem:[#allocation5 + $0x5b0] sm:$0xf]  ;;  %v5228_v3 = vld [vmem:[#allocation5 + $0x5c8] sm:$0xf0]  ;;  %v3970_v6 = vor.u32 %v5172_v1, %v3969_v0  ;;  %v5053_v8 = vld [vmem:[#allocation5 + $0x50] sm:$0xf0] }
  0x28   :  { %2314 = vmatpush.bf16.msra.mxu2 %v4026_v46  ;;  %v3717_v9 = vld [vmem:[#allocation5 + $0x1f8] sm:$0xf]  ;;  %v4194_v10 = vor.u32 %v5228_v3, %v4193_v2  ;;  %v5109_v11 = vld [vmem:[#allocation5 + $0x210] sm:$0xf0]  ;;  %v3494_v16 = vor.u32 %v5053_v8, %v3493_v7  ;;  %v3465_v17 = vld [vmem:[#allocation5] sm:$0xf] }
  0x29   :  { %2327 = vmatpush.bf16.msra.mxu3 %v4250_v50  ;;  %v3941_v12 = vld [vmem:[#allocation5 + $0x3b8] sm:$0xf]  ;;  %v5165_v13 = vld [vmem:[#allocation5 + $0x3d0] sm:$0xf0]  ;;  %v5046_v18 = vld [vmem:[#allocation5 + $0x18] sm:$0xf0]  ;;  %v3718_v19 = vor.u32 %v5109_v11, %v3717_v9 }
  0x2a   :  { %2289 = vmatpush.bf16.msra.mxu0 %v3550_v56  ;;  %v4165_v14 = vld [vmem:[#allocation5 + $0x578] sm:$0xf]  ;;  %v5221_v15 = vld [vmem:[#allocation5 + $0x590] sm:$0xf0]  ;;  %v3942_v20 = vor.u32 %v5165_v13, %v3941_v12  ;;  %v3689_v21 = vld [vmem:[#allocation5 + $0x1c0] sm:$0xf]  ;;  %v3466_v31 = vor.u32 %v5046_v18, %v3465_v17 }
  0x2b   :  { %2302 = vmatpush.bf16.msra.mxu1 %v3774_v57  ;;  %v5102_v22 = vld [vmem:[#allocation5 + $0x1d8] sm:$0xf0]  ;;  %v3913_v23 = vld [vmem:[#allocation5 + $0x380] sm:$0xf]  ;;  %v4166_v24 = vor.u32 %v5221_v15, %v4165_v14  ;;  %v4557_v28 = vld [vmem:[#allocation5 + $0x888] sm:$0xf] }
  0x2c   :  { %2315 = vmatpush.bf16.msra.mxu2 %v3998_v58  ;;  %v5158_v25 = vld [vmem:[#allocation5 + $0x398] sm:$0xf0]  ;;  %v4137_v26 = vld [vmem:[#allocation5 + $0x540] sm:$0xf]  ;;  %v5319_v29 = vld [vmem:[#allocation5 + $0x8a0] sm:$0xf0]  ;;  %v3690_v35 = vor.u32 %v5102_v22, %v3689_v21 }
  0x2d   :  { %2328 = vmatpush.bf16.msra.mxu3 %v4222_v62  ;;  %v5214_v27 = vld [vmem:[#allocation5 + $0x558] sm:$0xf0]  ;;  %v4781_v30 = vld [vmem:[#allocation5 + $0xa48] sm:$0xf]  ;;  %v5375_v32 = vld [vmem:[#allocation5 + $0xa60] sm:$0xf0]  ;;  %v3914_v36 = vor.u32 %v5158_v25, %v3913_v23  ;;  %v4558_v40 = vor.u32 %v5319_v29, %v4557_v28 }
  0x2e   :  { %2290 = vmatpush.bf16.msra.mxu0 %v3522_v4  ;;  %v5092_v33 = vld [vmem:[#allocation5 + $0x18c] sm:$0xf]  ;;  %v3663_v34 = vld [vmem:[#allocation5 + $0x1a4] sm:$0xf0]  ;;  %v4809_v37 = vld [vmem:[#allocation5 + $0xa80] sm:$0xf]  ;;  %v4138_v39 = vor.u32 %v5214_v27, %v4137_v26  ;;  %v4782_v44 = vor.u32 %v5375_v32, %v4781_v30 }
  0x2f   :  { %2303 = vmatpush.bf16.msra.mxu1 %v3746_v5  ;;  %v5382_v38 = vld [vmem:[#allocation5 + $0xa98] sm:$0xf0]  ;;  %v5148_v42 = vld [vmem:[#allocation5 + $0x34c] sm:$0xf]  ;;  %v3887_v43 = vld [vmem:[#allocation5 + $0x364] sm:$0xf0]  ;;  %v3666_v45 = vor.u32 %v5092_v33, %v3663_v34 }
  0x30   :  { %2316 = vmatpush.bf16.msra.mxu2 %v3970_v6  ;;  %v98_v41 = vld [vmem:[#allocation2 + $0x10] sm:$0xff]  ;;  %v4529_v46 = vld [vmem:[#allocation5 + $0x850] sm:$0xf]  ;;  %v5312_v47 = vld [vmem:[#allocation5 + $0x868] sm:$0xf0]  ;;  %v4810_v49 = vor.u32 %v5382_v38, %v4809_v37  ;;  %v3890_v54 = vor.u32 %v5148_v42, %v3887_v43  ;;  %vm2281_vm0 = vcmask 130048  }
  0x31   :  { %2329 = vmatpush.bf16.msra.mxu3 %v4194_v10  ;;  %v4753_v48 = vld [vmem:[#allocation5 + $0xa10] sm:$0xf]  ;;  %v5368_v50 = vld [vmem:[#allocation5 + $0xa28] sm:$0xf0]  ;;  %v5085_v51 = vld [vmem:[#allocation5 + $0x154] sm:$0xf]  ;;  %v5659_v53 = vpack.c.bf16 %v98_v41, %v98_v41  ;;  %v4530_v55 = vor.u32 %v5312_v47, %v4529_v46 }
  0x32   :  { %2291 = vmatpush.bf16.msra.mxu0 %v3494_v16  ;;  %v3635_v52 = vld [vmem:[#allocation5 + $0x16c] sm:$0xf0]  ;;  %v5141_v56 = vld [vmem:[#allocation5 + $0x314] sm:$0xf]  ;;  %v4754_v58 = vor.u32 %v5368_v50, %v4753_v48  ;;  %v4501_v60 = vld [vmem:[#allocation5 + $0x818] sm:$0xf] }
  0x33   :  { %2304 = vmatpush.bf16.msra.mxu1 %v3718_v19  ;;  %v3859_v57 = vld [vmem:[#allocation5 + $0x32c] sm:$0xf0]  ;;  %v3638_v59 = vor.u32 %v5085_v51, %v3635_v52  ;;  %v5305_v61 = vld [vmem:[#allocation5 + $0x830] sm:$0xf0]  ;;  %v4725_v62 = vld [vmem:[#allocation5 + $0x9d8] sm:$0xf] }
  0x34   :  { %2317 = vmatpush.bf16.msra.mxu2 %v3942_v20  ;;  %v5361_v63 = vld [vmem:[#allocation5 + $0x9f0] sm:$0xf0]  ;;  %v5078_v0 = vld [vmem:[#allocation5 + $0x11c] sm:$0xf]  ;;  %v3607_v1 = vld [vmem:[#allocation5 + $0x134] sm:$0xf0]  ;;  %v3862_v4 = vor.u32 %v5141_v56, %v3859_v57  ;;  %v4502_v5 = vor.u32 %v5305_v61, %v4501_v60 }
  0x35   :  { %2330 = vmatpush.bf16.msra.mxu3 %v4166_v24  ;;  %v5134_v2 = vld [vmem:[#allocation5 + $0x2dc] sm:$0xf]  ;;  %v3831_v3 = vld [vmem:[#allocation5 + $0x2f4] sm:$0xf0]  ;;  %v4473_v6 = vld [vmem:[#allocation5 + $0x7e0] sm:$0xf]  ;;  %v4726_v9 = vor.u32 %v5361_v63, %v4725_v62  ;;  %v3610_v10 = vor.u32 %v5078_v0, %v3607_v1 }
  0x36   :  { %2292 = vmatpush.bf16.msra.mxu0 %v3466_v31  ;;  %v5298_v7 = vld [vmem:[#allocation5 + $0x7f8] sm:$0xf0]  ;;  %v96_v8 = vld [vmem:[#allocation2] sm:$0xff]  ;;  %v4697_v11 = vld [vmem:[#allocation5 + $0x9a0] sm:$0xf]  ;;  %v3834_v20 = vor.u32 %v5134_v2, %v3831_v3  ;;  %vm3339_vm1 = vcmask 261120  }
  0x37   :  { %2305 = vmatpush.bf16.msra.mxu1 %v3690_v35  ;;  %v5662_v12 = vpack.c.bf16 %v96_v8, %v96_v8  ;;  %v99_v13 = vld [vmem:[#allocation2 + $0x18] sm:$0xff]  ;;  %v97_v14 = vld [vmem:[#allocation2 + $0x8] sm:$0xff]  ;;  %v5354_v15 = vld [vmem:[#allocation5 + $0x9b8] sm:$0xf0]  ;;  %v4474_v21 = vor.u32 %v5298_v7, %v4473_v6  ;;  %s5613_s2 = smov [#allocation11]   ;;  %s3451_s21 = sshll.u32 %s5793_s5, 4  ;;  %s3452_s21 = int_to_ptr.hbm [resolvable:$true] %s3451_s21 }
  0x38   :  { %2318 = vmatpush.bf16.msra.mxu2 %v3914_v36  ;;  %v5071_v16 = vld [vmem:[#allocation5 + $0xe4] sm:$0xf]  ;;  %v3579_v17 = vld [vmem:[#allocation5 + $0xfc] sm:$0xf0]  ;;  %v5664_v18 = vpack.c.bf16 %v99_v13, %v99_v13  ;;  %v5666_v19 = vpack.c.bf16 %v97_v14, %v97_v14  ;;  %v4698_v24 = vor.u32 %v5354_v15, %v4697_v11  ;;  %v4445_v26 = vld [vmem:[#allocation5 + $0x7a8] sm:$0xf] }
  0x39   :  { %2331 = vmatpush.bf16.msra.mxu3 %v4138_v39  ;;  %2293 = vmatmul.bf16.vlgmr.msra.gmra.mxu0 %v5662_v12  ;;  %v5127_v22 = vld [vmem:[#allocation5 + $0x2a4] sm:$0xf]  ;;  %v3803_v23 = vld [vmem:[#allocation5 + $0x2bc] sm:$0xf0]  ;;  %v3582_v25 = vor.u32 %v5071_v16, %v3579_v17  ;;  %v4669_v28 = vld [vmem:[#allocation5 + $0x968] sm:$0xf] }
  0x3a   :  { %2337 = vmatpush.bf16.msrb.mxu0 %v4558_v40  ;;  %v5291_v27 = vld [vmem:[#allocation5 + $0x7c0] sm:$0xf0]  ;;  %v5064_v30 = vld [vmem:[#allocation5 + $0xac] sm:$0xf]  ;;  %v3551_v31 = vld [vmem:[#allocation5 + $0xc4] sm:$0xf0]  ;;  %2306 = vmatmul.bf16.vlgmr.msra.gmra.mxu1 %v5666_v19  ;;  %v3806_v32 = vor.u32 %v5127_v22, %v3803_v23 }
  0x3b   :  { %2350 = vmatpush.bf16.msrb.mxu1 %v4782_v44  ;;  %2319 = vmatmul.bf16.vlgmr.msra.gmra.mxu2 %v5659_v53  ;;  %v5347_v29 = vld [vmem:[#allocation5 + $0x980] sm:$0xf0]  ;;  %v4446_v33 = vor.u32 %v5291_v27, %v4445_v26  ;;  %v5120_v34 = vld [vmem:[#allocation5 + $0x26c] sm:$0xf]  ;;  %v3775_v35 = vld [vmem:[#allocation5 + $0x284] sm:$0xf0]  ;;  %v3554_v38 = vor.u32 %v5064_v30, %v3551_v31 }
  0x3c   :  { %2370 = vmatpush.bf16.msrb.mxu2 %v4810_v49  ;;  %2332 = vmatmul.bf16.vlgmr.msra.gmra.mxu3 %v5664_v18  ;;  %v4417_v36 = vld [vmem:[#allocation5 + $0x770] sm:$0xf]  ;;  %v4670_v37 = vor.u32 %v5347_v29, %v4669_v28  ;;  %v5284_v39 = vld [vmem:[#allocation5 + $0x788] sm:$0xf0]  ;;  %v102_v41 = vld [vmem:[#allocation2 + $0x30] sm:$0xff]  ;;  %v3778_v46 = vor.u32 %v5120_v34, %v3775_v35  ;;  %s3449_s4 = sshll.u32 %s5613_s2, 4  ;;  %s3450_s4 = int_to_ptr.vmem [resolvable:$true] %s3449_s4 }
  0x3d   :  { %2376 = vmatpush.bf16.msrb.mxu3 %v3666_v45  ;;  %v4641_v40 = vld [vmem:[#allocation5 + $0x930] sm:$0xf]  ;;  %v5340_v42 = vld [vmem:[#allocation5 + $0x948] sm:$0xf0]  ;;  %v5057_v43 = vld [vmem:[#allocation5 + $0x74] sm:$0xf]  ;;  %v5671_v45 = vpack.c.bf16 %v102_v41, %v102_v41  ;;  %v4418_v47 = vor.u32 %v5284_v39, %v4417_v36 }
  0x3e   :  { %2338 = vmatpush.bf16.msrb.mxu0 %v4530_v55  ;;  %v3523_v44 = vld [vmem:[#allocation5 + $0x8c] sm:$0xf0]  ;;  %v5113_v48 = vld [vmem:[#allocation5 + $0x234] sm:$0xf]  ;;  %v4642_v50 = vor.u32 %v5340_v42, %v4641_v40  ;;  %v4389_v52 = vld [vmem:[#allocation5 + $0x738] sm:$0xf] }
  0x3f   :  { %2351 = vmatpush.bf16.msrb.mxu1 %v4754_v58  ;;  %v3747_v49 = vld [vmem:[#allocation5 + $0x24c] sm:$0xf0]  ;;  %v3526_v51 = vor.u32 %v5057_v43, %v3523_v44  ;;  %v4613_v55 = vld [vmem:[#allocation5 + $0x8f8] sm:$0xf]  ;;  %v5333_v56 = vld [vmem:[#allocation5 + $0x910] sm:$0xf0] }
  0x40   :  { %2389 = vmatpush.bf16.msra.mxu2 %v3890_v54  ;;  %v5277_v54 = vld [vmem:[#allocation5 + $0x750] sm:$0xf0]  ;;  %v5050_v57 = vld [vmem:[#allocation5 + $0x3c] sm:$0xf]  ;;  %v3495_v58 = vld [vmem:[#allocation5 + $0x54] sm:$0xf0]  ;;  %v4614_v0 = vor.u32 %v5333_v56, %v4613_v55 }
  0x41   :  { %2377 = vmatpush.bf16.msrb.mxu3 %v3638_v59  ;;  %v3750_v59 = vor.u32 %v5113_v48, %v3747_v49  ;;  %v4390_v60 = vor.u32 %v5277_v54, %v4389_v52  ;;  %v5106_v61 = vld [vmem:[#allocation5 + $0x1fc] sm:$0xf]  ;;  %v3719_v62 = vld [vmem:[#allocation5 + $0x214] sm:$0xf0]  ;;  %v4361_v63 = vld [vmem:[#allocation5 + $0x700] sm:$0xf]  ;;  %v3498_v1 = vor.u32 %v5050_v57, %v3495_v58 }
  0x42   :  { %2339 = vmatpush.bf16.msrb.mxu0 %v4502_v5  ;;  %v5270_v2 = vld [vmem:[#allocation5 + $0x718] sm:$0xf0]  ;;  %v4585_v3 = vld [vmem:[#allocation5 + $0x8c0] sm:$0xf]  ;;  %v5043_v5 = vld [vmem:[#allocation5 + $0x4] sm:$0xf]  ;;  %v3722_v11 = vor.u32 %v5106_v61, %v3719_v62 }
  0x43   :  { %2352 = vmatpush.bf16.msrb.mxu1 %v4726_v9  ;;  %v3467_v6 = vld [vmem:[#allocation5 + $0x1c] sm:$0xf0]  ;;  %v5204_v7 = vld [vmem:[#allocation5 + $0x50c] sm:$0xf]  ;;  %v4111_v8 = vld [vmem:[#allocation5 + $0x524] sm:$0xf0]  ;;  %v4362_v13 = vor.u32 %v5270_v2, %v4361_v63 }
  0x44   :  { %2390 = vmatpush.bf16.msra.mxu2 %v3862_v4  ;;  %v5326_v4 = vld [vmem:[#allocation5 + $0x8d8] sm:$0xf0]  ;;  %v5260_v9 = vld [vmem:[#allocation5 + $0x6cc] sm:$0xf]  ;;  %v4559_v15 = vld [vmem:[#allocation5 + $0x8a4] sm:$0xf0] }
  0x45   :  { %2378 = vmatpush.bf16.msrb.mxu3 %v3610_v10  ;;  %v4335_v10 = vld [vmem:[#allocation5 + $0x6e4] sm:$0xf0]  ;;  %v5316_v14 = vld [vmem:[#allocation5 + $0x88c] sm:$0xf]  ;;  %v4586_v17 = vor.u32 %v5326_v4, %v4585_v3  ;;  %v3691_v22 = vld [vmem:[#allocation5 + $0x1dc] sm:$0xf0] }
  0x46   :  { %2340 = vmatpush.bf16.msrb.mxu0 %v4474_v21  ;;  %v100_v16 = vld [vmem:[#allocation2 + $0x20] sm:$0xff]  ;;  %v5099_v21 = vld [vmem:[#allocation5 + $0x1c4] sm:$0xf]  ;;  %v5197_v27 = vld [vmem:[#allocation5 + $0x4d4] sm:$0xf]  ;;  %v4562_v29 = vor.u32 %v5316_v14, %v4559_v15 }
  0x47   :  { %2353 = vmatpush.bf16.msrb.mxu1 %v4698_v24  ;;  %v5372_v23 = vld [vmem:[#allocation5 + $0xa4c] sm:$0xf]  ;;  %v4114_v24 = vor.u32 %v5204_v7, %v4111_v8  ;;  %v4783_v26 = vld [vmem:[#allocation5 + $0xa64] sm:$0xf0]  ;;  %v101_v28 = vld [vmem:[#allocation2 + $0x28] sm:$0xff]  ;;  %v3694_v34 = vor.u32 %v5099_v21, %v3691_v22 }
  0x48   :  { %2391 = vmatpush.bf16.msra.mxu2 %v3834_v20  ;;  %v3470_v20 = vor.u32 %v5043_v5, %v3467_v6  ;;  %v4083_v30 = vld [vmem:[#allocation5 + $0x4ec] sm:$0xf0]  ;;  %v5253_v31 = vld [vmem:[#allocation5 + $0x694] sm:$0xf]  ;;  %v5190_v43 = vld [vmem:[#allocation5 + $0x49c] sm:$0xf] }
  0x49   :  { %2379 = vmatpush.bf16.msrb.mxu3 %v3582_v25  ;;  %v4338_v25 = vor.u32 %v5260_v9, %v4335_v10  ;;  %v5309_v35 = vld [vmem:[#allocation5 + $0x854] sm:$0xf]  ;;  %v4531_v36 = vld [vmem:[#allocation5 + $0x86c] sm:$0xf0]  ;;  %v4086_v39 = vor.u32 %v5197_v27, %v4083_v30  ;;  %v4279_v48 = vld [vmem:[#allocation5 + $0x674] sm:$0xf0] }
  0x4a   :  { %2341 = vmatpush.bf16.msrb.mxu0 %v4446_v33  ;;  %v5675_v33 = vpack.c.bf16 %v100_v16, %v100_v16  ;;  %v5365_v41 = vld [vmem:[#allocation5 + $0xa14] sm:$0xf]  ;;  %v4755_v42 = vld [vmem:[#allocation5 + $0xa2c] sm:$0xf0]  ;;  %v4534_v44 = vor.u32 %v5309_v35, %v4531_v36  ;;  %v5302_v49 = vld [vmem:[#allocation5 + $0x81c] sm:$0xf] }
  0x4b   :  { %2354 = vmatpush.bf16.msrb.mxu1 %v4670_v37  ;;  %4835 = vmatmul.msk.bf16.vlgmr.msrb.gmra.mxu2 %vm2281_vm0, %v5671_v45  ;;  %v4786_v37 = vor.u32 %v5372_v23, %v4783_v26  ;;  %v5358_v55 = vld [vmem:[#allocation5 + $0x9dc] sm:$0xf]  ;;  %v4727_v56 = vld [vmem:[#allocation5 + $0x9f4] sm:$0xf0]  ;;  %v5183_v57 = vld [vmem:[#allocation5 + $0x464] sm:$0xf] }
  0x4c   :  { %2392 = vmatpush.bf16.msra.mxu2 %v3806_v32  ;;  %v4307_v32 = vld [vmem:[#allocation5 + $0x6ac] sm:$0xf0]  ;;  %v4251_v61 = vld [vmem:[#allocation5 + $0x63c] sm:$0xf0]  ;;  %v5295_v62 = vld [vmem:[#allocation5 + $0x7e4] sm:$0xf] }
  0x4d   :  { %2380 = vmatpush.bf16.msrb.mxu3 %v3554_v38  ;;  %v5677_v38 = vpack.c.bf16 %v101_v28, %v101_v28  ;;  %v4310_v40 = vor.u32 %v5253_v31, %v4307_v32  ;;  %v4475_v63 = vld [vmem:[#allocation5 + $0x7fc] sm:$0xf0]  ;;  %v5351_v3 = vld [vmem:[#allocation5 + $0x9a4] sm:$0xf]  ;;  %v5176_v5 = vld [vmem:[#allocation5 + $0x42c] sm:$0xf] }
  0x4e   :  { %2342 = vmatpush.bf16.msrb.mxu0 %v4418_v47  ;;  %v5246_v47 = vld [vmem:[#allocation5 + $0x65c] sm:$0xf]  ;;  %v4699_v4 = vld [vmem:[#allocation5 + $0x9bc] sm:$0xf0]  ;;  %v4478_v6 = vor.u32 %v5295_v62, %v4475_v63  ;;  %v3999_v7 = vld [vmem:[#allocation5 + $0x444] sm:$0xf0] }
  0x4f   :  { %2355 = vmatpush.bf16.msrb.mxu1 %v4642_v50  ;;  %v4503_v50 = vld [vmem:[#allocation5 + $0x834] sm:$0xf0]  ;;  %v4282_v54 = vor.u32 %v5246_v47, %v4279_v48  ;;  %v5232_v8 = vld [vmem:[#allocation5 + $0x5ec] sm:$0xf]  ;;  %v4223_v9 = vld [vmem:[#allocation5 + $0x604] sm:$0xf0]  ;;  %v4002_v14 = vor.u32 %v5176_v5, %v3999_v7 }
  0x50   :  { %2393 = vmatpush.bf16.msra.mxu2 %v3778_v46  ;;  %v4055_v46 = vld [vmem:[#allocation5 + $0x4b4] sm:$0xf0]  ;;  %v4506_v58 = vor.u32 %v5302_v49, %v4503_v50  ;;  %v5288_v10 = vld [vmem:[#allocation5 + $0x7ac] sm:$0xf]  ;;  %v4226_v15 = vor.u32 %v5232_v8, %v4223_v9  ;;  %v3971_v22 = vld [vmem:[#allocation5 + $0x40c] sm:$0xf0] }
  0x51   :  { %2381 = vmatpush.bf16.msrb.mxu3 %v3526_v51  ;;  %v4758_v51 = vor.u32 %v5365_v41, %v4755_v42  ;;  %v4058_v52 = vor.u32 %v5190_v43, %v4055_v46  ;;  %v5344_v16 = vld [vmem:[#allocation5 + $0x96c] sm:$0xf]  ;;  %v5225_v23 = vld [vmem:[#allocation5 + $0x5b4] sm:$0xf]  ;;  %v4419_v26 = vld [vmem:[#allocation5 + $0x78c] sm:$0xf0] }
  0x52   :  { %2343 = vmatpush.bf16.msrb.mxu0 %v4390_v60  ;;  %v5239_v60 = vld [vmem:[#allocation5 + $0x624] sm:$0xf]  ;;  %v5337_v30 = vld [vmem:[#allocation5 + $0x934] sm:$0xf]  ;;  %v4643_v31 = vld [vmem:[#allocation5 + $0x94c] sm:$0xf0] }
  0x53   :  { %2356 = vmatpush.bf16.msrb.mxu1 %v4614_v0  ;;  %v4730_v0 = vor.u32 %v5358_v55, %v4727_v56  ;;  %v4254_v2 = vor.u32 %v5239_v60, %v4251_v61  ;;  %v5162_v32 = vld [vmem:[#allocation5 + $0x3bc] sm:$0xf]  ;;  %v3943_v35 = vld [vmem:[#allocation5 + $0x3d4] sm:$0xf0]  ;;  %v4646_v41 = vor.u32 %v5337_v30, %v4643_v31  ;;  %v5155_v47 = vld [vmem:[#allocation5 + $0x384] sm:$0xf] }
  0x54   :  { %2394 = vmatpush.bf16.msra.mxu2 %v3750_v59  ;;  %v4027_v59 = vld [vmem:[#allocation5 + $0x47c] sm:$0xf0]  ;;  %v5218_v36 = vld [vmem:[#allocation5 + $0x57c] sm:$0xf]  ;;  %v4615_v43 = vld [vmem:[#allocation5 + $0x914] sm:$0xf0] }
  0x55   :  { %2382 = vmatpush.bf16.msrb.mxu3 %v3498_v1  ;;  %v4030_v1 = vor.u32 %v5183_v57, %v4027_v59  ;;  %v5330_v42 = vld [vmem:[#allocation5 + $0x8fc] sm:$0xf]  ;;  %v3915_v48 = vld [vmem:[#allocation5 + $0x39c] sm:$0xf0]  ;;  %v5211_v49 = vld [vmem:[#allocation5 + $0x544] sm:$0xf] }
  0x56   :  { %2344 = vmatpush.bf16.msrb.mxu0 %v4362_v13  ;;  %v4702_v13 = vor.u32 %v5351_v3, %v4699_v4  ;;  %v3669_v55 = vld [vmem:[#allocation5 + $0x190] sm:$0xf]  ;;  %v5096_v56 = vld [vmem:[#allocation5 + $0x1a8] sm:$0xf0]  ;;  %v5379_v60 = vld [vmem:[#allocation5 + $0xa84] sm:$0xf]  ;;  %v3918_v62 = vor.u32 %v5155_v47, %v3915_v48 }
  0x57   :  { %2357 = vmatpush.bf16.msrb.mxu1 %v4586_v17  ;;  %v4671_v17 = vld [vmem:[#allocation5 + $0x984] sm:$0xf0]  ;;  %v4117_v57 = vld [vmem:[#allocation5 + $0x510] sm:$0xf]  ;;  %v5208_v59 = vld [vmem:[#allocation5 + $0x528] sm:$0xf0]  ;;  %v3670_v3 = vor.u32 %v5096_v56, %v3669_v55 }
  0x58   :  { %2395 = vmatpush.bf16.msra.mxu2 %v3722_v11  ;;  %v4447_v11 = vld [vmem:[#allocation5 + $0x7c4] sm:$0xf0]  ;;  %v4674_v27 = vor.u32 %v5344_v16, %v4671_v17  ;;  %v4811_v61 = vld [vmem:[#allocation5 + $0xa9c] sm:$0xf0]  ;;  %v4341_v4 = vld [vmem:[#allocation5 + $0x6d0] sm:$0xf] }
  0x59   :  { %2383 = vmatpush.bf16.msrb.mxu3 %v3470_v20  ;;  %2345 = vmatmul.bf16.vlgmr.msrb.gmra.mxu0 %v5675_v33  ;;  %v5169_v20 = vld [vmem:[#allocation5 + $0x3f4] sm:$0xf]  ;;  %v4450_v21 = vor.u32 %v5288_v10, %v4447_v11  ;;  %v5264_v5 = vld [vmem:[#allocation5 + $0x6e8] sm:$0xf0]  ;;  %v4814_v7 = vor.u32 %v5379_v60, %v4811_v61  ;;  %v3893_v8 = vld [vmem:[#allocation5 + $0x350] sm:$0xf] }
  0x5a   :  { %2402 = vmatpush.bf16.msra.mxu0 %v4114_v24  ;;  %2358 = vmatmul.bf16.vlgmr.msrb.gmra.mxu1 %v5677_v38  ;;  %v4195_v24 = vld [vmem:[#allocation5 + $0x5cc] sm:$0xf0]  ;;  %v3974_v28 = vor.u32 %v5169_v20, %v3971_v22  ;;  %v5152_v9 = vld [vmem:[#allocation5 + $0x368] sm:$0xf0]  ;;  %v3641_v10 = vld [vmem:[#allocation5 + $0x158] sm:$0xf]  ;;  %v4342_v16 = vor.u32 %v5264_v5, %v4341_v4 }
  0x5b   :  { %2415 = vmatpush.bf16.msra.mxu1 %v4338_v25  ;;  %v5281_v25 = vld [vmem:[#allocation5 + $0x774] sm:$0xf]  ;;  %v3894_v17 = vor.u32 %v5152_v9, %v3893_v8  ;;  %v4313_v20 = vld [vmem:[#allocation5 + $0x698] sm:$0xf]  ;;  %v4257_v47 = vld [vmem:[#allocation5 + $0x628] sm:$0xf] }
  0x5c   :  { %2396 = vmatpush.bf16.msra.mxu2 %v3694_v34  ;;  %2384 = vmatmul.bf16.vlgmr.msrb.gmra.mxu3 %v5662_v12  ;;  %v4422_v34 = vor.u32 %v5281_v25, %v4419_v26  ;;  %v5145_v25 = vld [vmem:[#allocation5 + $0x330] sm:$0xf0]  ;;  %v3613_v26 = vld [vmem:[#allocation5 + $0x120] sm:$0xf]  ;;  %v5243_v48 = vld [vmem:[#allocation5 + $0x640] sm:$0xf0] }
  0x5d   :  { %2428 = vmatpush.bf16.msra.mxu3 %v4562_v29  ;;  %v4198_v29 = vor.u32 %v5225_v23, %v4195_v24  ;;  %v3865_v24 = vld [vmem:[#allocation5 + $0x318] sm:$0xf]  ;;  %v5068_v55 = vld [vmem:[#allocation5 + $0xc8] sm:$0xf0]  ;;  %v4005_v56 = vld [vmem:[#allocation5 + $0x430] sm:$0xf] }
  0x5e   :  { %2403 = vmatpush.bf16.msra.mxu0 %v4086_v39  ;;  %v5274_v39 = vld [vmem:[#allocation5 + $0x73c] sm:$0xf]  ;;  %v3866_v31 = vor.u32 %v5145_v25, %v3865_v24  ;;  %v4229_v60 = vld [vmem:[#allocation5 + $0x5f0] sm:$0xf]  ;;  %v5236_v61 = vld [vmem:[#allocation5 + $0x608] sm:$0xf0] }
  0x5f   :  { %2416 = vmatpush.bf16.msra.mxu1 %v4310_v40  ;;  %2397 = vmatmul.bf16.vlgmr.msra.gmra.mxu2 %v5666_v19  ;;  %v4391_v40 = vld [vmem:[#allocation5 + $0x754] sm:$0xf0]  ;;  %v5173_v5 = vld [vmem:[#allocation5 + $0x410] sm:$0xf0]  ;;  %v4173_v24 = vld [vmem:[#allocation5 + $0x580] sm:$0xf] }
  0x60   :  { %2441 = vmatpush.bf16.msrb.mxu2 %v4786_v37  ;;  %v4167_v37 = vld [vmem:[#allocation5 + $0x594] sm:$0xf0]  ;;  %v4394_v50 = vor.u32 %v5274_v39, %v4391_v40  ;;  %v5138_v39 = vld [vmem:[#allocation5 + $0x2f8] sm:$0xf0]  ;;  %v3585_v40 = vld [vmem:[#allocation5 + $0xe8] sm:$0xf] }
  0x61   :  { %2429 = vmatpush.bf16.msra.mxu3 %v4534_v44  ;;  %v3946_v44 = vor.u32 %v5162_v32, %v3943_v35  ;;  %v4170_v46 = vor.u32 %v5218_v36, %v4167_v37  ;;  %v4285_v32 = vld [vmem:[#allocation5 + $0x660] sm:$0xf]  ;;  %v3977_v4 = vld [vmem:[#allocation5 + $0x3f8] sm:$0xf]  ;;  %v5229_v9 = vld [vmem:[#allocation5 + $0x5d0] sm:$0xf0] }
  0x62   :  { %2404 = vmatpush.bf16.msra.mxu0 %v4058_v52  ;;  %v5267_v52 = vld [vmem:[#allocation5 + $0x704] sm:$0xf]  ;;  %v3837_v37 = vld [vmem:[#allocation5 + $0x2e0] sm:$0xf]  ;;  %v4201_v8 = vld [vmem:[#allocation5 + $0x5b8] sm:$0xf] }
  0x63   :  { %2417 = vmatpush.bf16.msra.mxu1 %v4282_v54  ;;  %v4363_v54 = vld [vmem:[#allocation5 + $0x71c] sm:$0xf0]  ;;  %v5222_v25 = vld [vmem:[#allocation5 + $0x598] sm:$0xf0] }
  0x64   :  { %2442 = vmatpush.bf16.msrb.mxu2 %v4758_v51  ;;  %v4139_v51 = vld [vmem:[#allocation5 + $0x55c] sm:$0xf0] }
  0x65   :  { %2430 = vmatpush.bf16.msra.mxu3 %v4506_v58  ;;  %v4618_v58 = vor.u32 %v5330_v42, %v4615_v43  ;;  %v4142_v63 = vor.u32 %v5211_v49, %v4139_v51  ;;  %v4033_v42 = vld [vmem:[#allocation5 + $0x468] sm:$0xf]  ;;  %v5187_v43 = vld [vmem:[#allocation5 + $0x480] sm:$0xf0] }
  0x66   :  { %2405 = vmatpush.bf16.msra.mxu0 %v4030_v1  ;;  %v4587_v1 = vld [vmem:[#allocation5 + $0x8dc] sm:$0xf0]  ;;  %v3809_v51 = vld [vmem:[#allocation5 + $0x2a8] sm:$0xf] }
  0x67   :  { %2418 = vmatpush.bf16.msra.mxu1 %v4254_v2  ;;  %v4366_v2 = vor.u32 %v5267_v52, %v4363_v54  ;;  %v5131_v52 = vld [vmem:[#allocation5 + $0x2c0] sm:$0xf0]  ;;  %v3557_v54 = vld [vmem:[#allocation5 + $0xb0] sm:$0xf] }
  0x68   :  { %2443 = vmatpush.bf16.msrb.mxu2 %v4730_v0  ;;  %v5323_v0 = vld [vmem:[#allocation5 + $0x8c4] sm:$0xf] }
  0x69   :  { %2431 = vmatpush.bf16.msra.mxu3 %v4478_v6  ;;  %v4118_v6 = vor.u32 %v5208_v59, %v4117_v57  ;;  %v4590_v11 = vor.u32 %v5323_v0, %v4587_v1  ;;  %v5180_v57 = vld [vmem:[#allocation5 + $0x448] sm:$0xf0]  ;;  %v3810_v59 = vor.u32 %v5131_v52, %v3809_v51  ;;  %v3781_v0 = vld [vmem:[#allocation5 + $0x270] sm:$0xf]  ;;  %v5093_v52 = vld [vmem:[#allocation5 + $0x194] sm:$0xf] }
  0x6a   :  { %2406 = vmatpush.bf16.msra.mxu0 %v4002_v14  ;;  %v4089_v14 = vld [vmem:[#allocation5 + $0x4d8] sm:$0xf]  ;;  %v5124_v1 = vld [vmem:[#allocation5 + $0x288] sm:$0xf0] }
  0x6b   :  { %2419 = vmatpush.bf16.msra.mxu1 %v4226_v15  ;;  %v5201_v15 = vld [vmem:[#allocation5 + $0x4f0] sm:$0xf0] }
  0x6c   :  { %2444 = vmatpush.bf16.msrb.mxu2 %v4702_v13  ;;  %v5089_v13 = vld [vmem:[#allocation5 + $0x170] sm:$0xf0]  ;;  %v4090_v23 = vor.u32 %v5201_v15, %v4089_v14  ;;  %v3501_v15 = vld [vmem:[#allocation5 + $0x40] sm:$0xf] }
  0x6d   :  { %2432 = vmatpush.bf16.msra.mxu3 %v4450_v21  ;;  %v5257_v21 = vld [vmem:[#allocation5 + $0x6b0] sm:$0xf0]  ;;  %v3642_v22 = vor.u32 %v5089_v13, %v3641_v10  ;;  %v3753_v13 = vld [vmem:[#allocation5 + $0x238] sm:$0xf] }
  0x6e   :  { %2407 = vmatpush.bf16.msra.mxu0 %v3974_v28  ;;  %v4061_v28 = vld [vmem:[#allocation5 + $0x4a0] sm:$0xf]  ;;  %v4314_v30 = vor.u32 %v5257_v21, %v4313_v20  ;;  %v5117_v14 = vld [vmem:[#allocation5 + $0x250] sm:$0xf0]  ;;  %v5166_v20 = vld [vmem:[#allocation5 + $0x3d8] sm:$0xf0]  ;;  %v4202_v21 = vor.u32 %v5229_v9, %v4201_v8 }
  0x6f   :  { %2420 = vmatpush.bf16.msra.mxu1 %v4198_v29  ;;  %v5194_v29 = vld [vmem:[#allocation5 + $0x4b8] sm:$0xf0] }
  0x70   :  { %2445 = vmatpush.bf16.msrb.mxu2 %v4674_v27  ;;  %v5082_v27 = vld [vmem:[#allocation5 + $0x138] sm:$0xf0]  ;;  %v4062_v36 = vor.u32 %v5194_v29, %v4061_v28  ;;  %v3473_v29 = vld [vmem:[#allocation5 + $0x8] sm:$0xf] }
  0x71   :  { %2433 = vmatpush.bf16.msra.mxu3 %v4422_v34  ;;  %v5250_v34 = vld [vmem:[#allocation5 + $0x678] sm:$0xf0]  ;;  %v3614_v35 = vor.u32 %v5082_v27, %v3613_v26 }
  0x72   :  { %2408 = vmatpush.bf16.msra.mxu0 %v3946_v44  ;;  %v4286_v44 = vor.u32 %v5250_v34, %v4285_v32  ;;  %v5110_v28 = vld [vmem:[#allocation5 + $0x218] sm:$0xf0]  ;;  %v5159_v32 = vld [vmem:[#allocation5 + $0x3a0] sm:$0xf0]  ;;  %v4565_v34 = vld [vmem:[#allocation5 + $0x890] sm:$0xf] }
  0x73   :  { %2421 = vmatpush.bf16.msra.mxu1 %v4170_v46  ;;  %v3838_v46 = vor.u32 %v5138_v39, %v3837_v37  ;;  %v4817_v37 = vld [vmem:[#allocation5 + $0xa88] sm:$0xf]  ;;  %v5383_v39 = vld [vmem:[#allocation5 + $0xaa0] sm:$0xf0]  ;;  %v5306_v8 = vld [vmem:[#allocation5 + $0x838] sm:$0xf0] }
  0x74   :  { %2446 = vmatpush.bf16.msrb.mxu2 %v4646_v41  ;;  %v5075_v41 = vld [vmem:[#allocation5 + $0x100] sm:$0xf0]  ;;  %v4818_v51 = vor.u32 %v5383_v39, %v4817_v37 }
  0x75   :  { %2434 = vmatpush.bf16.msra.mxu3 %v4394_v50  ;;  %v3586_v49 = vor.u32 %v5075_v41, %v3585_v40  ;;  %v4034_v50 = vor.u32 %v5187_v43, %v4033_v42  ;;  %v3697_v41 = vld [vmem:[#allocation5 + $0x1c8] sm:$0xf]  ;;  %v5215_v43 = vld [vmem:[#allocation5 + $0x560] sm:$0xf0] }
  0x76   :  { %2409 = vmatpush.bf16.msra.mxu0 %v3918_v62  ;;  %v3558_v62 = vor.u32 %v5068_v55, %v3557_v54  ;;  %v4145_v42 = vld [vmem:[#allocation5 + $0x548] sm:$0xf]  ;;  %v3671_v54 = vld [vmem:[#allocation5 + $0x1ac] sm:$0xf0]  ;;  %v5149_v55 = vld [vmem:[#allocation5 + $0x354] sm:$0xf] }
  0x77   :  { %2422 = vmatpush.bf16.msra.mxu1 %v4142_v63  ;;  %v4006_v63 = vor.u32 %v5180_v57, %v4005_v56  ;;  %v4146_v56 = vor.u32 %v5215_v43, %v4145_v42  ;;  %v3895_v57 = vld [vmem:[#allocation5 + $0x36c] sm:$0xf0] }
  0x78   :  { %2447 = vmatpush.bf16.msrb.mxu2 %v4618_v58  ;;  %v4258_v58 = vor.u32 %v5243_v48, %v4257_v47  ;;  %v5103_v47 = vld [vmem:[#allocation5 + $0x1e0] sm:$0xf0]  ;;  %v4789_v48 = vld [vmem:[#allocation5 + $0xa50] sm:$0xf] }
  0x79   :  { %2435 = vmatpush.bf16.msra.mxu3 %v4366_v2  ;;  %2410 = vmatmul.bf16.vlgmr.msra.gmra.mxu0 %v5659_v53  ;;  %v3529_v2 = vld [vmem:[#allocation5 + $0x78] sm:$0xf] }
  0x7a   :  { %2493 = vmatpush.bf16.msrb.mxu0 %v4118_v6  ;;  %2423 = vmatmul.bf16.vlgmr.msra.gmra.mxu1 %v5664_v18  ;;  %v4230_v6 = vor.u32 %v5236_v61, %v4229_v60  ;;  %v3698_v60 = vor.u32 %v5103_v47, %v3697_v41  ;;  %v5348_v41 = vld [vmem:[#allocation5 + $0x988] sm:$0xf0]  ;;  %v5121_v47 = vld [vmem:[#allocation5 + $0x274] sm:$0xf] }
  0x7b   :  { %2467 = vmatpush.bf16.msrb.mxu1 %v3670_v3  ;;  %v5061_v3 = vld [vmem:[#allocation5 + $0x90] sm:$0xf0] }
  0x7c   :  { %2448 = vmatpush.bf16.msrb.mxu2 %v4590_v11  ;;  %2436 = vmatmul.bf16.vlgmr.msra.gmra.mxu3 %v5675_v33  ;;  %v3530_v10 = vor.u32 %v5061_v3, %v3529_v2  ;;  %v3978_v11 = vor.u32 %v5173_v5, %v3977_v4  ;;  %v5086_v3 = vld [vmem:[#allocation5 + $0x15c] sm:$0xf]  ;;  %v3643_v4 = vld [vmem:[#allocation5 + $0x174] sm:$0xf0] }
  0x7d   :  { %2461 = vmatpush.bf16.msrb.mxu3 %v4814_v7  ;;  %v3782_v7 = vor.u32 %v5124_v1, %v3781_v0  ;;  %v5369_v0 = vld [vmem:[#allocation5 + $0xa30] sm:$0xf0]  ;;  %v3898_v1 = vor.u32 %v5149_v55, %v3895_v57  ;;  %v5142_v5 = vld [vmem:[#allocation5 + $0x31c] sm:$0xf] }
  0x7e   :  { %2494 = vmatpush.bf16.msrb.mxu0 %v4090_v23  ;;  %v3725_v23 = vld [vmem:[#allocation5 + $0x200] sm:$0xf]  ;;  %v5341_v55 = vld [vmem:[#allocation5 + $0x950] sm:$0xf0] }
  0x7f   :  { %2468 = vmatpush.bf16.msrb.mxu1 %v3642_v22  ;;  %2449 = vmatmul.bf16.vlgmr.msrb.gmra.mxu2 %v5677_v38  ;;  %v3754_v22 = vor.u32 %v5117_v14, %v3753_v13  ;;  %v3726_v40 = vor.u32 %v5110_v28, %v3725_v23  ;;  %v5362_v13 = vld [vmem:[#allocation5 + $0x9f8] sm:$0xf0]  ;;  %v5299_v23 = vld [vmem:[#allocation5 + $0x800] sm:$0xf0] }
  0x80   :  { %2506 = vmatpush.bf16.msra.mxu2 %v4342_v16  ;;  %v5054_v16 = vld [vmem:[#allocation5 + $0x58] sm:$0xf0] }
  0x81   :  { %2480 = vmatpush.bf16.msra.mxu3 %v3894_v17  ;;  %v3949_v17 = vld [vmem:[#allocation5 + $0x3c0] sm:$0xf]  ;;  %v3502_v26 = vor.u32 %v5054_v16, %v3501_v15  ;;  %v5079_v16 = vld [vmem:[#allocation5 + $0x124] sm:$0xf] }
  0x82   :  { %2495 = vmatpush.bf16.msrb.mxu0 %v4062_v36  ;;  %v3950_v27 = vor.u32 %v5166_v20, %v3949_v17  ;;  %v5320_v36 = vld [vmem:[#allocation5 + $0x8a8] sm:$0xf0]  ;;  %v3615_v17 = vld [vmem:[#allocation5 + $0x13c] sm:$0xf0]  ;;  %v5135_v20 = vld [vmem:[#allocation5 + $0x2e4] sm:$0xf] }
  0x83   :  { %2469 = vmatpush.bf16.msrb.mxu1 %v3614_v35  ;;  %v4174_v35 = vor.u32 %v5222_v25, %v4173_v24  ;;  %v3618_v25 = vor.u32 %v5079_v16, %v3615_v17  ;;  %v4593_v17 = vld [vmem:[#allocation5 + $0x8c8] sm:$0xf] }
  0x84   :  { %2507 = vmatpush.bf16.msra.mxu2 %v4314_v30  ;;  %v5047_v30 = vld [vmem:[#allocation5 + $0x20] sm:$0xf0] }
  0x85   :  { %2481 = vmatpush.bf16.msra.mxu3 %v3866_v31  ;;  %v3921_v31 = vld [vmem:[#allocation5 + $0x388] sm:$0xf] }
  0x86   :  { %2496 = vmatpush.bf16.msrb.mxu0 %v4034_v50  ;;  %v4566_v50 = vor.u32 %v5320_v36, %v4565_v34  ;;  %v3811_v34 = vld [vmem:[#allocation5 + $0x2c4] sm:$0xf0]  ;;  %v5292_v36 = vld [vmem:[#allocation5 + $0x7c8] sm:$0xf0] }
  0x87   :  { %2470 = vmatpush.bf16.msrb.mxu1 %v3586_v49  ;;  %v5376_v49 = vld [vmem:[#allocation5 + $0xa68] sm:$0xf0] }
  0x88   :  { %2508 = vmatpush.bf16.msra.mxu2 %v4286_v44  ;;  %v3474_v44 = vor.u32 %v5047_v30, %v3473_v29  ;;  %v4790_v61 = vor.u32 %v5376_v49, %v4789_v48  ;;  %v5072_v30 = vld [vmem:[#allocation5 + $0xec] sm:$0xf]  ;;  %v3783_v48 = vld [vmem:[#allocation5 + $0x28c] sm:$0xf0]  ;;  %v4425_v49 = vld [vmem:[#allocation5 + $0x778] sm:$0xf] }
  0x89   :  { %2482 = vmatpush.bf16.msra.mxu3 %v3838_v46  ;;  %v3922_v46 = vor.u32 %v5159_v32, %v3921_v31  ;;  %v3587_v31 = vld [vmem:[#allocation5 + $0x104] sm:$0xf0]  ;;  %v5128_v32 = vld [vmem:[#allocation5 + $0x2ac] sm:$0xf] }
  0x8a   :  { %2497 = vmatpush.bf16.msrb.mxu0 %v4006_v63  ;;  %v4761_v63 = vld [vmem:[#allocation5 + $0xa18] sm:$0xf]  ;;  %v3590_v39 = vor.u32 %v5072_v30, %v3587_v31  ;;  %v3814_v42 = vor.u32 %v5128_v32, %v3811_v34  ;;  %v5317_v30 = vld [vmem:[#allocation5 + $0x894] sm:$0xf]  ;;  %v4567_v31 = vld [vmem:[#allocation5 + $0x8ac] sm:$0xf0] }
  0x8b   :  { %2471 = vmatpush.bf16.msrb.mxu1 %v3558_v62  ;;  %v3674_v62 = vor.u32 %v5093_v52, %v3671_v54  ;;  %v4762_v9 = vor.u32 %v5369_v0, %v4761_v63  ;;  %v4649_v54 = vld [vmem:[#allocation5 + $0x938] sm:$0xf]  ;;  %v5278_v63 = vld [vmem:[#allocation5 + $0x758] sm:$0xf0]  ;;  %v5373_v32 = vld [vmem:[#allocation5 + $0xa54] sm:$0xf] }
  0x8c   :  { %2509 = vmatpush.bf16.msra.mxu2 %v4258_v58  ;;  %4836 = vmatmul.msk.bf16.vlgmr.msrb.gmra.mxu3 %vm2281_vm0, %v5671_v45  ;;  %v4537_v58 = vld [vmem:[#allocation5 + $0x858] sm:$0xf]  ;;  %v4650_v0 = vor.u32 %v5341_v55, %v4649_v54  ;;  %v4063_v54 = vld [vmem:[#allocation5 + $0x4bc] sm:$0xf0] }
  0x8d   :  { %2483 = vmatpush.bf16.msra.mxu3 %v3810_v59  ;;  %v5313_v59 = vld [vmem:[#allocation5 + $0x870] sm:$0xf0] }
  0x8e   :  { %2498 = vmatpush.bf16.msrb.mxu0 %v3978_v11  ;;  %v4538_v2 = vor.u32 %v5313_v59, %v4537_v58  ;;  %v4733_v11 = vld [vmem:[#allocation5 + $0x9e0] sm:$0xf]  ;;  %v5058_v58 = vld [vmem:[#allocation5 + $0x7c] sm:$0xf]  ;;  %v3531_v59 = vld [vmem:[#allocation5 + $0x94] sm:$0xf0] }
  0x8f   :  { %2472 = vmatpush.bf16.msrb.mxu1 %v3530_v10  ;;  %v3646_v10 = vor.u32 %v5086_v3, %v3643_v4  ;;  %v4734_v24 = vor.u32 %v5362_v13, %v4733_v11  ;;  %v5334_v3 = vld [vmem:[#allocation5 + $0x918] sm:$0xf0]  ;;  %v5271_v11 = vld [vmem:[#allocation5 + $0x720] sm:$0xf0]  ;;  %v5205_v13 = vld [vmem:[#allocation5 + $0x514] sm:$0xf] }
  0x90   :  { %2510 = vmatpush.bf16.msra.mxu2 %v4230_v6  ;;  %v3867_v6 = vld [vmem:[#allocation5 + $0x334] sm:$0xf0] }
  0x91   :  { %2484 = vmatpush.bf16.msra.mxu3 %v3782_v7  ;;  %v4509_v7 = vld [vmem:[#allocation5 + $0x820] sm:$0xf]  ;;  %v3870_v14 = vor.u32 %v5142_v5, %v3867_v6  ;;  %v5051_v6 = vld [vmem:[#allocation5 + $0x44] sm:$0xf] }
  0x92   :  { %2499 = vmatpush.bf16.msrb.mxu0 %v3950_v27  ;;  %v4510_v15 = vor.u32 %v5306_v8, %v4509_v7  ;;  %v5355_v27 = vld [vmem:[#allocation5 + $0x9c0] sm:$0xf0]  ;;  %v3503_v7 = vld [vmem:[#allocation5 + $0x5c] sm:$0xf0] }
  0x93   :  { %2473 = vmatpush.bf16.msrb.mxu1 %v3502_v26  ;;  %v4705_v26 = vld [vmem:[#allocation5 + $0x9a8] sm:$0xf]  ;;  %v5107_v8 = vld [vmem:[#allocation5 + $0x204] sm:$0xf]  ;;  %v3506_v16 = vor.u32 %v5051_v6, %v3503_v7  ;;  %v5699_v7 = vld [vmem:[#allocation7] sm:$0x7f] }
  0x94   :  { %2511 = vmatpush.bf16.msra.mxu2 %v4202_v21  ;;  %v3839_v21 = vld [vmem:[#allocation5 + $0x2fc] sm:$0xf0]  ;;  %v4706_v37 = vor.u32 %v5355_v27, %v4705_v26  ;;  %v3699_v27 = vld [vmem:[#allocation5 + $0x1e4] sm:$0xf0] }
  0x95   :  { %2485 = vmatpush.bf16.msra.mxu3 %v3754_v22  ;;  %v4481_v22 = vld [vmem:[#allocation5 + $0x7e8] sm:$0xf]  ;;  %v3842_v28 = vor.u32 %v5135_v20, %v3839_v21  ;;  %v5327_v20 = vld [vmem:[#allocation5 + $0x8e0] sm:$0xf0] }
  0x96   :  { %2500 = vmatpush.bf16.msrb.mxu0 %v3922_v46  ;;  %v4482_v29 = vor.u32 %v5299_v23, %v4481_v22  ;;  %v3559_v46 = vld [vmem:[#allocation5 + $0xcc] sm:$0xf0]  ;;  %v5044_v23 = vld [vmem:[#allocation5 + $0xc] sm:$0xf]  ;;  %v4594_v34 = vor.u32 %v5327_v20, %v4593_v17  ;;  %v4259_v6 = vld [vmem:[#allocation5 + $0x644] sm:$0xf0] }
  0x97   :  { %2474 = vmatpush.bf16.msrb.mxu1 %v3474_v44  ;;  %v5065_v44 = vld [vmem:[#allocation5 + $0xb4] sm:$0xf]  ;;  %v503_v17 = vperm.slane %v5699_v7, 0 }
  0x98   :  { %2512 = vmatpush.bf16.msra.mxu2 %v4174_v35  ;;  %v4453_v35 = vld [vmem:[#allocation5 + $0x7b0] sm:$0xf]  ;;  %v3562_v52 = vor.u32 %v5065_v44, %v3559_v46  ;;  %v4315_v44 = vld [vmem:[#allocation5 + $0x6b4] sm:$0xf0] }
  0x99   :  { %2486 = vmatpush.bf16.msra.mxu3 %v3726_v40  ;;  %2501 = vmatmul.bf16.vlgmr.msrb.gmra.mxu0 %v5659_v53  ;;  %v4677_v40 = vld [vmem:[#allocation5 + $0x970] sm:$0xf]  ;;  %v4454_v43 = vor.u32 %v5292_v36, %v4453_v35  ;;  %v5198_v36 = vld [vmem:[#allocation5 + $0x4dc] sm:$0xf] }
  0x9a   :  { %2552 = vmatpush.bf16.msra.mxu0 %v4818_v51  ;;  %2475 = vmatmul.bf16.vlgmr.msrb.gmra.mxu1 %v5662_v12  ;;  %v4678_v51 = vor.u32 %v5348_v41, %v4677_v40  ;;  %v4791_v35 = vld [vmem:[#allocation5 + $0xa6c] sm:$0xf0] }
  0x9b   :  { %2519 = vmatpush.bf16.msra.mxu1 %v4566_v50  ;;  %v5285_v50 = vld [vmem:[#allocation5 + $0x790] sm:$0xf0]  ;;  %v4794_v46 = vor.u32 %v5373_v32, %v4791_v35 }
  0x9c   :  { %2513 = vmatpush.bf16.msra.mxu2 %v4146_v56  ;;  %v3786_v56 = vor.u32 %v5121_v47, %v3783_v48  ;;  %v4426_v57 = vor.u32 %v5285_v50, %v4425_v49  ;;  %v5310_v48 = vld [vmem:[#allocation5 + $0x85c] sm:$0xf]  ;;  %v4539_v49 = vld [vmem:[#allocation5 + $0x874] sm:$0xf0] }
  0x9d   :  { %2487 = vmatpush.bf16.msra.mxu3 %v3698_v60  ;;  %v5114_v60 = vld [vmem:[#allocation5 + $0x23c] sm:$0xf] }
  0x9e   :  { %2571 = vmatpush.bf16.msrb.mxu0 %v3898_v1  ;;  %v3534_v1 = vor.u32 %v5058_v58, %v3531_v59  ;;  %v5366_v50 = vld [vmem:[#allocation5 + $0xa1c] sm:$0xf]  ;;  %v4287_v58 = vld [vmem:[#allocation5 + $0x67c] sm:$0xf0] }
  0x9f   :  { %2520 = vmatpush.bf16.msra.mxu1 %v4538_v2  ;;  %2514 = vmatmul.bf16.vlgmr.msra.gmra.mxu2 %v5664_v18  ;;  %v4621_v2 = vld [vmem:[#allocation5 + $0x900] sm:$0xf] }
  0xa0   :  { %2558 = vmatpush.bf16.msrb.mxu2 %v3674_v62  ;;  %2488 = vmatmul.bf16.vlgmr.msra.gmra.mxu3 %v5666_v19  ;;  %v4397_v62 = vld [vmem:[#allocation5 + $0x740] sm:$0xf] }
  0xa1   :  { %2532 = vmatpush.bf16.msrb.mxu3 %v4790_v61  ;;  %v3755_v61 = vld [vmem:[#allocation5 + $0x254] sm:$0xf0]  ;;  %v4398_v5 = vor.u32 %v5278_v63, %v4397_v62  ;;  %v4511_v62 = vld [vmem:[#allocation5 + $0x83c] sm:$0xf0]  ;;  %v5359_v63 = vld [vmem:[#allocation5 + $0x9e4] sm:$0xf] }
  0xa2   :  { %2572 = vmatpush.bf16.msrb.mxu0 %v3870_v14  ;;  %v3758_v4 = vor.u32 %v5114_v60, %v3755_v61  ;;  %v4119_v14 = vld [vmem:[#allocation5 + $0x52c] sm:$0xf0]  ;;  %v5303_v61 = vld [vmem:[#allocation5 + $0x824] sm:$0xf] }
  0xa3   :  { %2521 = vmatpush.bf16.msra.mxu1 %v4510_v15  ;;  %v4622_v15 = vor.u32 %v5334_v3, %v4621_v2  ;;  %v4122_v26 = vor.u32 %v5205_v13, %v4119_v14  ;;  %v4035_v2 = vld [vmem:[#allocation5 + $0x484] sm:$0xf0]  ;;  %v5352_v13 = vld [vmem:[#allocation5 + $0x9ac] sm:$0xf] }
  0xa4   :  { %2559 = vmatpush.bf16.msrb.mxu2 %v3646_v10  ;;  %v4369_v10 = vld [vmem:[#allocation5 + $0x708] sm:$0xf] }
  0xa5   :  { %2533 = vmatpush.bf16.msrb.mxu3 %v4762_v9  ;;  %v3727_v9 = vld [vmem:[#allocation5 + $0x21c] sm:$0xf0]  ;;  %v4370_v22 = vor.u32 %v5271_v11, %v4369_v10  ;;  %v5296_v10 = vld [vmem:[#allocation5 + $0x7ec] sm:$0xf]  ;;  %v4483_v11 = vld [vmem:[#allocation5 + $0x804] sm:$0xf0] }
  0xa6   :  { %2573 = vmatpush.bf16.msrb.mxu0 %v3842_v28  ;;  %v3730_v21 = vor.u32 %v5107_v8, %v3727_v9  ;;  %v5261_v28 = vld [vmem:[#allocation5 + $0x6d4] sm:$0xf]  ;;  %v4707_v14 = vld [vmem:[#allocation5 + $0x9c4] sm:$0xf0] }
  0xa7   :  { %2522 = vmatpush.bf16.msra.mxu1 %v4482_v29  ;;  %v4343_v29 = vld [vmem:[#allocation5 + $0x6ec] sm:$0xf0] }
  0xa8   :  { %2560 = vmatpush.bf16.msrb.mxu2 %v3618_v25  ;;  %v5100_v25 = vld [vmem:[#allocation5 + $0x1cc] sm:$0xf]  ;;  %v4346_v41 = vor.u32 %v5261_v28, %v4343_v29  ;;  %v5345_v28 = vld [vmem:[#allocation5 + $0x974] sm:$0xf]  ;;  %v4679_v29 = vld [vmem:[#allocation5 + $0x98c] sm:$0xf0] }
  0xa9   :  { %2534 = vmatpush.bf16.msrb.mxu3 %v4734_v24  ;;  %4837 = vmatmul.msk.bf16.vlgmr.msra.gmra.mxu0 %vm2281_vm0, %v5671_v45  ;;  %v3475_v24 = vld [vmem:[#allocation5 + $0x24] sm:$0xf0]  ;;  %v3702_v40 = vor.u32 %v5100_v25, %v3699_v27  ;;  %v4455_v27 = vld [vmem:[#allocation5 + $0x7cc] sm:$0xf0] }
  0xaa   :  { %2574 = vmatpush.bf16.msrb.mxu0 %v3814_v42  ;;  %v4570_v42 = vor.u32 %v5317_v30, %v4567_v31  ;;  %v5170_v30 = vld [vmem:[#allocation5 + $0x3fc] sm:$0xf]  ;;  %v3979_v31 = vld [vmem:[#allocation5 + $0x414] sm:$0xf0] }
  0xab   :  { %2523 = vmatpush.bf16.msra.mxu1 %v4454_v43  ;;  %v5254_v43 = vld [vmem:[#allocation5 + $0x69c] sm:$0xf] }
  0xac   :  { %2561 = vmatpush.bf16.msrb.mxu2 %v3590_v39  ;;  %v3478_v39 = vor.u32 %v5044_v23, %v3475_v24  ;;  %v4318_v55 = vor.u32 %v5254_v43, %v4315_v44  ;;  %v4231_v23 = vld [vmem:[#allocation5 + $0x60c] sm:$0xf0]  ;;  %v4710_v24 = vor.u32 %v5352_v13, %v4707_v14  ;;  %v5282_v43 = vld [vmem:[#allocation5 + $0x77c] sm:$0xf]  ;;  %v4427_v44 = vld [vmem:[#allocation5 + $0x794] sm:$0xf0] }
  0xad   :  { %2535 = vmatpush.bf16.msrb.mxu3 %v4706_v37  ;;  %v4091_v37 = vld [vmem:[#allocation5 + $0x4f4] sm:$0xf0] }
  0xae   :  { %2575 = vmatpush.bf16.msrb.mxu0 %v3786_v56  ;;  %v4094_v47 = vor.u32 %v5198_v36, %v4091_v37  ;;  %v4542_v56 = vor.u32 %v5310_v48, %v4539_v49  ;;  %v5226_v37 = vld [vmem:[#allocation5 + $0x5bc] sm:$0xf]  ;;  %v4651_v48 = vld [vmem:[#allocation5 + $0x954] sm:$0xf0]  ;;  %v5163_v49 = vld [vmem:[#allocation5 + $0x3c4] sm:$0xf] }
  0xaf   :  { %2524 = vmatpush.bf16.msra.mxu1 %v4426_v57  ;;  %v5247_v57 = vld [vmem:[#allocation5 + $0x664] sm:$0xf] }
  0xb0   :  { %2562 = vmatpush.bf16.msrb.mxu2 %v3562_v52  ;;  %v5191_v52 = vld [vmem:[#allocation5 + $0x4a4] sm:$0xf]  ;;  %v4290_v3 = vor.u32 %v5247_v57, %v4287_v58 }
  0xb1   :  { %2536 = vmatpush.bf16.msrb.mxu3 %v4678_v51  ;;  %v4763_v51 = vld [vmem:[#allocation5 + $0xa34] sm:$0xf0]  ;;  %v4066_v60 = vor.u32 %v5191_v52, %v4063_v54  ;;  %v4430_v54 = vor.u32 %v5282_v43, %v4427_v44  ;;  %v3873_v43 = vld [vmem:[#allocation5 + $0x320] sm:$0xf]  ;;  %v5146_v44 = vld [vmem:[#allocation5 + $0x338] sm:$0xf0] }
  0xb2   :  { %2576 = vmatpush.bf16.msrb.mxu0 %v3758_v4  ;;  %v4766_v59 = vor.u32 %v5366_v50, %v4763_v51  ;;  %v4514_v4 = vor.u32 %v5303_v61, %v4511_v62  ;;  %v3951_v50 = vld [vmem:[#allocation5 + $0x3dc] sm:$0xf0]  ;;  %v5331_v62 = vld [vmem:[#allocation5 + $0x904] sm:$0xf] }
  0xb3   :  { %2525 = vmatpush.bf16.msra.mxu1 %v4398_v5  ;;  %v5240_v5 = vld [vmem:[#allocation5 + $0x62c] sm:$0xf]  ;;  %v4399_v61 = vld [vmem:[#allocation5 + $0x75c] sm:$0xf0] }
  0xb4   :  { %2563 = vmatpush.bf16.msrb.mxu2 %v3534_v1  ;;  %v5184_v1 = vld [vmem:[#allocation5 + $0x46c] sm:$0xf]  ;;  %v4262_v20 = vor.u32 %v5240_v5, %v4259_v6 }
  0xb5   :  { %2537 = vmatpush.bf16.msrb.mxu3 %v4650_v0  ;;  %v4735_v0 = vld [vmem:[#allocation5 + $0x9fc] sm:$0xf0]  ;;  %v4038_v9 = vor.u32 %v5184_v1, %v4035_v2  ;;  %v3923_v1 = vld [vmem:[#allocation5 + $0x3a4] sm:$0xf0] }
  0xb6   :  { %2577 = vmatpush.bf16.msrb.mxu0 %v3730_v21  ;;  %v4738_v8 = vor.u32 %v5359_v63, %v4735_v0  ;;  %v4486_v21 = vor.u32 %v5296_v10, %v4483_v11  ;;  %v2294_v32 = vpop.f32.mrf.mxu0  ;;  %v4623_v63 = vld [vmem:[#allocation5 + $0x91c] sm:$0xf0]  ;;  %v5156_v0 = vld [vmem:[#allocation5 + $0x38c] sm:$0xf]  ;;  %v4147_v10 = vld [vmem:[#allocation5 + $0x564] sm:$0xf0] }
  0xb7   :  { %2526 = vmatpush.bf16.msra.mxu1 %v4370_v22  ;;  %v5233_v22 = vld [vmem:[#allocation5 + $0x5f4] sm:$0xf]  ;;  %v4626_v14 = vor.u32 %v5331_v62, %v4623_v63  ;;  %v5195_v62 = vld [vmem:[#allocation5 + $0x4c0] sm:$0xf0]  ;;  %v4293_v63 = vld [vmem:[#allocation5 + $0x668] sm:$0xf] }
  0xb8   :  { %2564 = vmatpush.bf16.msrb.mxu2 %v3506_v16  ;;  %v4007_v16 = vld [vmem:[#allocation5 + $0x44c] sm:$0xf0]  ;;  %v4234_v35 = vor.u32 %v5233_v22, %v4231_v23  ;;  %v4595_v22 = vld [vmem:[#allocation5 + $0x8e4] sm:$0xf0] }
  0xb9   :  { %2538 = vmatpush.bf16.msrb.mxu3 %v4622_v15  ;;  %v5177_v15 = vld [vmem:[#allocation5 + $0x434] sm:$0xf] }
  0xba   :  { %2527 = vmatmul.bf16.vlgmr.msra.gmra.mxu1 %v5675_v33  ;;  %2578 = vmatpush.bf16.msrb.mxu0 %v3702_v40  ;;  %v4010_v25 = vor.u32 %v5177_v15, %v4007_v16  ;;  %v3926_v15 = vor.u32 %v5156_v0, %v3923_v1  ;;  %v5268_v16 = vld [vmem:[#allocation5 + $0x70c] sm:$0xf]  ;;  %v5251_v0 = vld [vmem:[#allocation5 + $0x680] sm:$0xf0] }
  0xbb   :  { %2584 = vmatpush.bf16.msrb.mxu1 %v4122_v26  ;;  %v5289_v26 = vld [vmem:[#allocation5 + $0x7b4] sm:$0xf] }
  0xbc   :  { %2565 = vmatpush.bf16.msrb.mxu2 %v3478_v39  ;;  %v4458_v36 = vor.u32 %v5289_v26, %v4455_v27  ;;  %v4203_v39 = vld [vmem:[#allocation5 + $0x5d4] sm:$0xf0]  ;;  %v5153_v27 = vld [vmem:[#allocation5 + $0x370] sm:$0xf0] }
  0xbd   :  { %2539 = vmatpush.bf16.msrb.mxu3 %v4594_v34  ;;  %2579 = vmatmul.bf16.vlgmr.msrb.gmra.mxu0 %v5666_v19  ;;  %v2295_v34 = vadd.f32 %v2294_v32, %v503_v17  ;;  %v4206_v52 = vor.u32 %v5226_v37, %v4203_v39  ;;  %v4371_v17 = vld [vmem:[#allocation5 + $0x724] sm:$0xf0]  ;;  %v3901_v26 = vld [vmem:[#allocation5 + $0x358] sm:$0xf]  ;;  %v5265_v32 = vld [vmem:[#allocation5 + $0x6f0] sm:$0xf0] }
  0xbe   :  { %2623 = vmatpush.bf16.msra.mxu0 %v4794_v46  ;;  %v2320_v40 = vpop.f32.mrf.mxu2  ;;  %v5338_v46 = vld [vmem:[#allocation5 + $0x93c] sm:$0xf]  ;;  %v2296_v2 = vpop.f32.mrf.mxu0  ;;  %v3902_v37 = vor.u32 %v5153_v27, %v3901_v26  ;;  %v3649_v39 = vld [vmem:[#allocation5 + $0x160] sm:$0xf]  ;;  %v5069_v26 = vld [vmem:[#allocation5 + $0xd0] sm:$0xf0] }
  0xbf   :  { %2585 = vmatpush.bf16.msrb.mxu1 %v4094_v47  ;;  %2566 = vmatmul.bf16.vlgmr.msrb.gmra.mxu2 %v5662_v12  ;;  %v2307_v47 = vpop.f32.mrf.mxu1  ;;  %v4654_v58 = vor.u32 %v5338_v46, %v4651_v48  ;;  %v2333_v5 = vpop.f32.mrf.mxu3  ;;  %v4097_v46 = vld [vmem:[#allocation5 + $0x4e0] sm:$0xf]  ;;  %v5202_v48 = vld [vmem:[#allocation5 + $0x4f8] sm:$0xf0]  ;;  %v504_v27 = vperm.slane %v5699_v7, 1 }
  0xc0   :  { %2610 = vmatpush.bf16.msra.mxu2 %v4570_v42  ;;  %2540 = vmatmul.bf16.vlgmr.msrb.gmra.mxu3 %v5677_v38  ;;  %v3982_v42 = vor.u32 %v5170_v30, %v3979_v31  ;;  %v2308_v51 = vadd.f32 %v2307_v47, %v2295_v34  ;;  %v5209_v30 = vld [vmem:[#allocation5 + $0x530] sm:$0xf0]  ;;  %v4349_v31 = vld [vmem:[#allocation5 + $0x6d8] sm:$0xf]  ;;  %v4374_v34 = vor.u32 %v5268_v16, %v4371_v17  ;;  %v4265_v16 = vld [vmem:[#allocation5 + $0x630] sm:$0xf] }
  0xc1   :  { %2597 = vmatpush.bf16.msra.mxu3 %v4346_v41  ;;  %v4682_v41 = vor.u32 %v5345_v28, %v4679_v29  ;;  %v4125_v28 = vld [vmem:[#allocation5 + $0x518] sm:$0xf]  ;;  %v5244_v17 = vld [vmem:[#allocation5 + $0x648] sm:$0xf0] }
  0xc2   :  { %2624 = vmatpush.bf16.msra.mxu0 %v4766_v59  ;;  %v2321_v57 = vadd.f32 %v2320_v40, %v2308_v51  ;;  %v3954_v59 = vor.u32 %v5163_v49, %v3951_v50  ;;  %v5090_v40 = vld [vmem:[#allocation5 + $0x178] sm:$0xf0]  ;;  %v4321_v49 = vld [vmem:[#allocation5 + $0x6a0] sm:$0xf] }
  0xc3   :  { %2586 = vmatpush.bf16.msrb.mxu1 %v4066_v60  ;;  %v5275_v60 = vld [vmem:[#allocation5 + $0x744] sm:$0xf]  ;;  %v5258_v50 = vld [vmem:[#allocation5 + $0x6b8] sm:$0xf0] }
  0xc4   :  { %2611 = vmatpush.bf16.msra.mxu2 %v4542_v56  ;;  %v4175_v56 = vld [vmem:[#allocation5 + $0x59c] sm:$0xf0]  ;;  %v5702_v11 = vadd.f32 %v2333_v5, %v2321_v57  ;;  %v4098_v57 = vor.u32 %v5202_v48, %v4097_v46 }
  0xc5   :  { %2598 = vmatpush.bf16.msra.mxu3 %v4318_v55  ;;  %v5219_v55 = vld [vmem:[#allocation5 + $0x584] sm:$0xf]  ;;  %v3761_v48 = vld [vmem:[#allocation5 + $0x240] sm:$0xf] }
  0xc6   :  { %2625 = vmatpush.bf16.msra.mxu0 %v4738_v8  ;;  %v4178_v6 = vor.u32 %v5219_v55, %v4175_v56  ;;  %v4402_v8 = vor.u32 %v5275_v60, %v4399_v61  ;;  %v2322_v13 = vpop.f32.mrf.mxu2  ;;  %v3621_v55 = vld [vmem:[#allocation5 + $0x128] sm:$0xf]  ;;  %v5083_v56 = vld [vmem:[#allocation5 + $0x140] sm:$0xf0] }
  0xc7   :  { %2587 = vmatpush.bf16.msrb.mxu1 %v4038_v9  ;;  %v5212_v9 = vld [vmem:[#allocation5 + $0x54c] sm:$0xf]  ;;  %v2335_v47 = vpop.f32.mrf.mxu3  ;;  %v5139_v60 = vld [vmem:[#allocation5 + $0x300] sm:$0xf0]  ;;  %v4069_v61 = vld [vmem:[#allocation5 + $0x4a8] sm:$0xf]  ;;  %v3622_v1 = vor.u32 %v5083_v56, %v3621_v55 }
  0xc8   :  { %2612 = vmatpush.bf16.msra.mxu2 %v4514_v4  ;;  %v4819_v4 = vld [vmem:[#allocation5 + $0xaa4] sm:$0xf0]  ;;  %v4150_v29 = vor.u32 %v5212_v9, %v4147_v10  ;;  %v3817_v9 = vld [vmem:[#allocation5 + $0x2b0] sm:$0xf]  ;;  %v5132_v10 = vld [vmem:[#allocation5 + $0x2c8] sm:$0xf0] }
  0xc9   :  { %2599 = vmatpush.bf16.msra.mxu3 %v4290_v3  ;;  %v5380_v3 = vld [vmem:[#allocation5 + $0xa8c] sm:$0xf]  ;;  %v4041_v13 = vld [vmem:[#allocation5 + $0x470] sm:$0xf] }
  0xca   :  { %2626 = vmatpush.bf16.msra.mxu0 %v4710_v24  ;;  %v4822_v23 = vor.u32 %v5380_v3, %v4819_v4  ;;  %v3677_v24 = vld [vmem:[#allocation5 + $0x198] sm:$0xf]  ;;  %v3593_v3 = vld [vmem:[#allocation5 + $0xf0] sm:$0xf]  ;;  %v5076_v4 = vld [vmem:[#allocation5 + $0x108] sm:$0xf0] }
  0xcb   :  { %2588 = vmatpush.bf16.msrb.mxu1 %v4010_v25  ;;  %v5097_v25 = vld [vmem:[#allocation5 + $0x1b0] sm:$0xf0] }
  0xcc   :  { %2613 = vmatpush.bf16.msra.mxu2 %v4486_v21  ;;  %v2309_v21 = vpop.f32.mrf.mxu1 }
  0xcd   :  { %2600 = vmatpush.bf16.msra.mxu3 %v4262_v20  ;;  %v5324_v20 = vld [vmem:[#allocation5 + $0x8cc] sm:$0xf] }
  0xce   :  { %2627 = vmatpush.bf16.msra.mxu0 %v4682_v41  ;;  %v4126_v41 = vor.u32 %v5209_v30, %v4125_v28  ;;  %v2372_v51 = vpop.f32.mrf.mxu2 }
  0xcf   :  { %2589 = vmatpush.bf16.msrb.mxu1 %v3982_v42  ;;  %v4350_v42 = vor.u32 %v5265_v32, %v4349_v31  ;;  %v5125_v31 = vld [vmem:[#allocation5 + $0x290] sm:$0xf0]  ;;  %v4013_v32 = vld [vmem:[#allocation5 + $0x438] sm:$0xf] }
  0xd0   :  { %2614 = vmatpush.bf16.msra.mxu2 %v4458_v36  ;;  %v3678_v36 = vor.u32 %v5097_v25, %v3677_v24  ;;  %v3818_v24 = vor.u32 %v5132_v10, %v3817_v9  ;;  %v3565_v25 = vld [vmem:[#allocation5 + $0xb8] sm:$0xf] }
  0xd1   :  { %2601 = vmatpush.bf16.msra.mxu3 %v4234_v35  ;;  %v4598_v35 = vor.u32 %v5324_v20, %v4595_v22 }
  0xd2   :  { %2628 = vmatpush.bf16.msra.mxu0 %v4654_v58  ;;  %v4322_v58 = vor.u32 %v5258_v50, %v4321_v49  ;;  %v5118_v49 = vld [vmem:[#allocation5 + $0x258] sm:$0xf0]  ;;  %v3985_v50 = vld [vmem:[#allocation5 + $0x400] sm:$0xf] }
  0xd3   :  { %2590 = vmatpush.bf16.msrb.mxu1 %v3954_v59  ;;  %v3845_v59 = vld [vmem:[#allocation5 + $0x2e8] sm:$0xf] }
  0xd4   :  { %2615 = vmatpush.bf16.msra.mxu2 %v4430_v54  ;;  %v3874_v54 = vor.u32 %v5146_v44, %v3873_v43  ;;  %v3846_v2 = vor.u32 %v5139_v60, %v3845_v59  ;;  %v5062_v43 = vld [vmem:[#allocation5 + $0x98] sm:$0xf0]  ;;  %v3762_v59 = vor.u32 %v5118_v49, %v3761_v48  ;;  %v3509_v60 = vld [vmem:[#allocation5 + $0x48] sm:$0xf]  ;;  %v4769_v48 = vld [vmem:[#allocation5 + $0xa20] sm:$0xf] }
  0xd5   :  { %2602 = vmatpush.bf16.msra.mxu3 %v4206_v52  ;;  %v3650_v52 = vor.u32 %v5090_v40, %v3649_v39  ;;  %v3566_v39 = vor.u32 %v5069_v26, %v3565_v25  ;;  %v5321_v25 = vld [vmem:[#allocation5 + $0x8b0] sm:$0xf0]  ;;  %v5370_v49 = vld [vmem:[#allocation5 + $0xa38] sm:$0xf0] }
  0xd6   :  { %2629 = vmatpush.bf16.msra.mxu0 %v4626_v14  ;;  %v2346_v5 = vpop.f32.mrf.mxu0  ;;  %v2374_v21 = vpop.f32.mrf.mxu2 }
  0xd7   :  { %2591 = vmatpush.bf16.msrb.mxu1 %v3926_v15  ;;  %v2347_v14 = vadd.f32 %v2346_v5, %v5702_v11  ;;  %v5188_v15 = vld [vmem:[#allocation5 + $0x488] sm:$0xf0]  ;;  %v2359_v20 = vpop.f32.mrf.mxu1  ;;  %v3789_v11 = vld [vmem:[#allocation5 + $0x278] sm:$0xf]  ;;  %v5223_v5 = vld [vmem:[#allocation5 + $0x5a0] sm:$0xf0] }
  0xd8   :  { %2616 = vmatpush.bf16.msra.mxu2 %v4402_v8  ;;  %v4294_v8 = vor.u32 %v5251_v0, %v4293_v63  ;;  %v4042_v28 = vor.u32 %v5188_v15, %v4041_v13  ;;  %v3790_v40 = vor.u32 %v5125_v31, %v3789_v11  ;;  %v3733_v0 = vld [vmem:[#allocation5 + $0x208] sm:$0xf]  ;;  %v5048_v13 = vld [vmem:[#allocation5 + $0x28] sm:$0xf0] }
  0xd9   :  { %2603 = vmatpush.bf16.msra.mxu3 %v4178_v6  ;;  %v4070_v6 = vor.u32 %v5195_v62, %v4069_v61  ;;  %v2360_v22 = vadd.f32 %v2359_v20, %v2347_v14  ;;  %v5055_v61 = vld [vmem:[#allocation5 + $0x60] sm:$0xf0]  ;;  %v3705_v14 = vld [vmem:[#allocation5 + $0x1d0] sm:$0xf]  ;;  %v5104_v15 = vld [vmem:[#allocation5 + $0x1e8] sm:$0xf0] }
  0xda   :  { %2592 = vmatmul.bf16.vlgmr.msrb.gmra.mxu1 %v5659_v53  ;;  %2630 = vmatpush.bf16.msra.mxu0 %v4598_v35  ;;  %v4237_v35 = vld [vmem:[#allocation5 + $0x5f8] sm:$0xf]  ;;  %v3510_v9 = vor.u32 %v5055_v61, %v3509_v60  ;;  %v3929_v20 = vld [vmem:[#allocation5 + $0x390] sm:$0xf]  ;;  %v5160_v21 = vld [vmem:[#allocation5 + $0x3a8] sm:$0xf0]  ;;  %v3706_v31 = vor.u32 %v5104_v15, %v3705_v14 }
  0xdb   :  { %2643 = vmatpush.bf16.msra.mxu1 %v4822_v23  ;;  %v3594_v23 = vor.u32 %v5076_v4, %v3593_v3  ;;  %v5710_v30 = vadd.f32 %v2372_v51, %v2360_v22  ;;  %v5174_v51 = vld [vmem:[#allocation5 + $0x418] sm:$0xf0]  ;;  %v5167_v3 = vld [vmem:[#allocation5 + $0x3e0] sm:$0xf0]  ;;  %v4181_v4 = vld [vmem:[#allocation5 + $0x588] sm:$0xf] }
  0xdc   :  { %2617 = vmatpush.bf16.msra.mxu2 %v4374_v34  ;;  %v5181_v34 = vld [vmem:[#allocation5 + $0x450] sm:$0xf0]  ;;  %v3986_v62 = vor.u32 %v5174_v51, %v3985_v50  ;;  %v4153_v22 = vld [vmem:[#allocation5 + $0x550] sm:$0xf]  ;;  %v5087_v50 = vld [vmem:[#allocation5 + $0x164] sm:$0xf] }
  0xdd   :  { %2604 = vmatpush.bf16.msra.mxu3 %v4150_v29  ;;  %2631 = vmatmul.bf16.vlgmr.msra.gmra.mxu0 %v5677_v38  ;;  %v4266_v29 = vor.u32 %v5244_v17, %v4265_v16  ;;  %v4014_v46 = vor.u32 %v5181_v34, %v4013_v32  ;;  %v4182_v17 = vor.u32 %v5223_v5, %v4181_v4  ;;  %v3679_v32 = vld [vmem:[#allocation5 + $0x1b4] sm:$0xf0]  ;;  %v4825_v34 = vld [vmem:[#allocation5 + $0xa90] sm:$0xf]  ;;  %v3651_v51 = vld [vmem:[#allocation5 + $0x17c] sm:$0xf0] }
  0xde   :  { %2688 = vmatpush.bf16.msrb.mxu0 %v4350_v42  ;;  %v3537_v42 = vld [vmem:[#allocation5 + $0x80] sm:$0xf]  ;;  %v2348_v44 = vpop.f32.mrf.mxu0  ;;  %v3654_v60 = vor.u32 %v5087_v50, %v3651_v51  ;;  %v5307_v61 = vld [vmem:[#allocation5 + $0x840] sm:$0xf0]  ;;  %v5300_v14 = vld [vmem:[#allocation5 + $0x808] sm:$0xf0] }
  0xdf   :  { %2662 = vmatpush.bf16.msrb.mxu1 %v3902_v37  ;;  %2618 = vmatmul.bf16.vlgmr.msra.gmra.mxu2 %v5675_v33  ;;  %v2385_v37 = vpop.f32.mrf.mxu3  ;;  %v2361_v56 = vpop.f32.mrf.mxu1  ;;  %v4713_v15 = vld [vmem:[#allocation5 + $0x9b0] sm:$0xf]  ;;  %v5059_v51 = vld [vmem:[#allocation5 + $0x84] sm:$0xf] }
  0xe0   :  { %2675 = vmatpush.bf16.msrb.mxu2 %v4126_v41  ;;  %2605 = vmatmul.bf16.vlgmr.msra.gmra.mxu3 %v5664_v18  ;;  %v2386_v41 = vadd.f32 %v2385_v37, %v504_v27  ;;  %v4797_v27 = vld [vmem:[#allocation5 + $0xa58] sm:$0xf]  ;;  %v5143_v56 = vld [vmem:[#allocation5 + $0x324] sm:$0xf] }
  0xe1   :  { %2649 = vmatpush.bf16.msrb.mxu3 %v3678_v36  ;;  %v5237_v36 = vld [vmem:[#allocation5 + $0x610] sm:$0xf0] }
  0xe2   :  { %2689 = vmatpush.bf16.msrb.mxu0 %v4322_v58  ;;  %v4238_v47 = vor.u32 %v5237_v36, %v4237_v35  ;;  %v2398_v55 = vpop.f32.mrf.mxu2  ;;  %v3538_v58 = vor.u32 %v5062_v43, %v3537_v42  ;;  %v5384_v35 = vld [vmem:[#allocation5 + $0xaa8] sm:$0xf0]  ;;  %v3930_v36 = vor.u32 %v5160_v21, %v3929_v20  ;;  %v3903_v42 = vld [vmem:[#allocation5 + $0x374] sm:$0xf0]  ;;  %v4545_v43 = vld [vmem:[#allocation5 + $0x860] sm:$0xf] }
  0xe3   :  { %2663 = vmatpush.bf16.msrb.mxu1 %v3874_v54  ;;  %v5230_v54 = vld [vmem:[#allocation5 + $0x5d8] sm:$0xf0]  ;;  %v5073_v20 = vld [vmem:[#allocation5 + $0xf4] sm:$0xf]  ;;  %v3595_v21 = vld [vmem:[#allocation5 + $0x10c] sm:$0xf0] }
  0xe4   :  { %2676 = vmatpush.bf16.msrb.mxu2 %v4098_v57  ;;  %v5714_v57 = vadd.f32 %v2398_v55, %v2386_v41  ;;  %v5150_v41 = vld [vmem:[#allocation5 + $0x35c] sm:$0xf]  ;;  %v4770_v55 = vor.u32 %v5370_v49, %v4769_v48  ;;  %v4657_v48 = vld [vmem:[#allocation5 + $0x940] sm:$0xf] }
  0xe5   :  { %2650 = vmatpush.bf16.msrb.mxu3 %v3650_v52  ;;  %v4209_v52 = vld [vmem:[#allocation5 + $0x5c0] sm:$0xf]  ;;  %v5342_v49 = vld [vmem:[#allocation5 + $0x958] sm:$0xf0] }
  0xe6   :  { %2690 = vmatpush.bf16.msrb.mxu0 %v4294_v8  ;;  %v4210_v63 = vor.u32 %v5230_v54, %v4209_v52  ;;  %v3481_v8 = vld [vmem:[#allocation5 + $0x10] sm:$0xf]  ;;  %v3906_v52 = vor.u32 %v5150_v41, %v3903_v42  ;;  %v5122_v41 = vld [vmem:[#allocation5 + $0x27c] sm:$0xf]  ;;  %v3791_v42 = vld [vmem:[#allocation5 + $0x294] sm:$0xf0] }
  0xe7   :  { %2664 = vmatpush.bf16.msrb.mxu1 %v3846_v2  ;;  %v3957_v2 = vld [vmem:[#allocation5 + $0x3c8] sm:$0xf]  ;;  %v3482_v11 = vor.u32 %v5048_v13, %v3481_v8 }
  0xe8   :  { %2677 = vmatpush.bf16.msrb.mxu2 %v4070_v6  ;;  %v2387_v6 = vpop.f32.mrf.mxu3  ;;  %v3958_v16 = vor.u32 %v5167_v3, %v3957_v2  ;;  %v3847_v8 = vld [vmem:[#allocation5 + $0x304] sm:$0xf0] }
  0xe9   :  { %2651 = vmatpush.bf16.msrb.mxu3 %v3622_v1  ;;  %v5111_v1 = vld [vmem:[#allocation5 + $0x220] sm:$0xf0]  ;;  %v5136_v6 = vld [vmem:[#allocation5 + $0x2ec] sm:$0xf] }
  0xea   :  { %2691 = vmatpush.bf16.msrb.mxu0 %v4266_v29  ;;  %4838 = vmatmul.msk.bf16.vlgmr.msra.gmra.mxu1 %vm2281_vm0, %v5671_v45  ;;  %v3734_v10 = vor.u32 %v5111_v1, %v3733_v0  ;;  %v2400_v26 = vpop.f32.mrf.mxu2  ;;  %v5094_v29 = vld [vmem:[#allocation5 + $0x19c] sm:$0xf]  ;;  %v5080_v0 = vld [vmem:[#allocation5 + $0x12c] sm:$0xf]  ;;  %v3623_v1 = vld [vmem:[#allocation5 + $0x144] sm:$0xf0] }
  0xeb   :  { %2665 = vmatpush.bf16.msrb.mxu1 %v3818_v24  ;;  %v4573_v24 = vld [vmem:[#allocation5 + $0x898] sm:$0xf]  ;;  %v3682_v44 = vor.u32 %v5094_v29, %v3679_v32  ;;  %v3626_v13 = vor.u32 %v5080_v0, %v3623_v1  ;;  %v5129_v26 = vld [vmem:[#allocation5 + $0x2b4] sm:$0xf]  ;;  %v5066_v32 = vld [vmem:[#allocation5 + $0xbc] sm:$0xf] }
  0xec   :  { %2678 = vmatpush.bf16.msrb.mxu2 %v4042_v28  ;;  %v5377_v28 = vld [vmem:[#allocation5 + $0xa70] sm:$0xf0]  ;;  %v5279_v0 = vld [vmem:[#allocation5 + $0x760] sm:$0xf0]  ;;  %v4629_v1 = vld [vmem:[#allocation5 + $0x908] sm:$0xf] }
  0xed   :  { %2652 = vmatpush.bf16.msrb.mxu3 %v3594_v23  ;;  %v5216_v23 = vld [vmem:[#allocation5 + $0x568] sm:$0xf0]  ;;  %v5293_v29 = vld [vmem:[#allocation5 + $0x7d0] sm:$0xf0] }
  0xee   :  { %2692 = vmatpush.bf16.msrb.mxu0 %v4238_v47  ;;  %v4154_v37 = vor.u32 %v5216_v23, %v4153_v22  ;;  %v5314_v47 = vld [vmem:[#allocation5 + $0x878] sm:$0xf0]  ;;  %v3850_v23 = vor.u32 %v5136_v6, %v3847_v8  ;;  %v5108_v8 = vld [vmem:[#allocation5 + $0x20c] sm:$0xf] }
  0xef   :  { %2666 = vmatpush.bf16.msrb.mxu1 %v3790_v40  ;;  %v4798_v40 = vor.u32 %v5377_v28, %v4797_v27  ;;  %v4546_v54 = vor.u32 %v5314_v47, %v4545_v43  ;;  %v3819_v27 = vld [vmem:[#allocation5 + $0x2cc] sm:$0xf0]  ;;  %v4461_v28 = vld [vmem:[#allocation5 + $0x7b8] sm:$0xf]  ;;  %v4433_v43 = vld [vmem:[#allocation5 + $0x780] sm:$0xf] }
  0xf0   :  { %2679 = vmatpush.bf16.msrb.mxu2 %v4014_v46  ;;  %v4826_v46 = vor.u32 %v5384_v35, %v4825_v34  ;;  %v3567_v34 = vld [vmem:[#allocation5 + $0xd4] sm:$0xf0]  ;;  %v5286_v47 = vld [vmem:[#allocation5 + $0x798] sm:$0xf0] }
  0xf1   :  { %2653 = vmatpush.bf16.msrb.mxu3 %v3566_v39  ;;  %v4574_v39 = vor.u32 %v5321_v25, %v4573_v24 }
  0xf2   :  { %2693 = vmatpush.bf16.msrb.mxu0 %v4210_v63  ;;  %v5363_v63 = vld [vmem:[#allocation5 + $0xa00] sm:$0xf0] }
  0xf3   :  { %2667 = vmatpush.bf16.msrb.mxu1 %v3762_v59  ;;  %v4517_v59 = vld [vmem:[#allocation5 + $0x828] sm:$0xf] }
  0xf4   :  { %2680 = vmatpush.bf16.msrb.mxu2 %v3986_v62  ;;  %v4741_v62 = vld [vmem:[#allocation5 + $0x9e8] sm:$0xf]  ;;  %v4518_v4 = vor.u32 %v5307_v61, %v4517_v59  ;;  %v4658_v59 = vor.u32 %v5342_v49, %v4657_v48  ;;  %v3763_v61 = vld [vmem:[#allocation5 + $0x25c] sm:$0xf0]  ;;  %v5311_v49 = vld [vmem:[#allocation5 + $0x864] sm:$0xf] }
  0xf5   :  { %2654 = vmatpush.bf16.msrb.mxu3 %v3538_v58  ;;  %v3875_v58 = vld [vmem:[#allocation5 + $0x33c] sm:$0xf0]  ;;  %v4742_v5 = vor.u32 %v5363_v63, %v4741_v62  ;;  %v4405_v62 = vld [vmem:[#allocation5 + $0x748] sm:$0xf] }
  0xf6   :  { %2694 = vmatpush.bf16.msrb.mxu0 %v4182_v17  ;;  %v3878_v2 = vor.u32 %v5143_v56, %v3875_v58  ;;  %v2411_v3 = vpop.f32.mrf.mxu0  ;;  %v3794_v56 = vor.u32 %v5122_v41, %v3791_v42  ;;  %v4434_v58 = vor.u32 %v5286_v47, %v4433_v43  ;;  %v5199_v42 = vld [vmem:[#allocation5 + $0x4e4] sm:$0xf]  ;;  %v4099_v43 = vld [vmem:[#allocation5 + $0x4fc] sm:$0xf0] }
  0xf7   :  { %2668 = vmatpush.bf16.msrb.mxu1 %v3734_v10  ;;  %v2412_v10 = vadd.f32 %v2411_v3, %v5714_v57  ;;  %v2424_v17 = vpop.f32.mrf.mxu1  ;;  %v3598_v57 = vor.u32 %v5073_v20, %v3595_v21  ;;  %v5052_v3 = vld [vmem:[#allocation5 + $0x4c] sm:$0xf]  ;;  %v5045_v21 = vld [vmem:[#allocation5 + $0x14] sm:$0xf]  ;;  %v4323_v48 = vld [vmem:[#allocation5 + $0x6bc] sm:$0xf0] }
  0xf8   :  { %2681 = vmatpush.bf16.msrb.mxu2 %v3958_v16  ;;  %v5356_v16 = vld [vmem:[#allocation5 + $0x9c8] sm:$0xf0] }
  0xf9   :  { %2655 = vmatpush.bf16.msrb.mxu3 %v3510_v9  ;;  %v4489_v9 = vld [vmem:[#allocation5 + $0x7f0] sm:$0xf]  ;;  %v2425_v22 = vadd.f32 %v2424_v17, %v2412_v10  ;;  %v4714_v25 = vor.u32 %v5356_v16, %v4713_v15  ;;  %v4406_v10 = vor.u32 %v5279_v0, %v4405_v62  ;;  %v5272_v15 = vld [vmem:[#allocation5 + $0x728] sm:$0xf0]  ;;  %v4071_v62 = vld [vmem:[#allocation5 + $0x4c4] sm:$0xf0] }
  0xfa   :  { %2695 = vmatpush.bf16.msrb.mxu0 %v4154_v37  ;;  %v4490_v24 = vor.u32 %v5300_v14, %v4489_v9  ;;  %v3735_v9 = vld [vmem:[#allocation5 + $0x224] sm:$0xf0]  ;;  %v4377_v14 = vld [vmem:[#allocation5 + $0x710] sm:$0xf]  ;;  %v5328_v20 = vld [vmem:[#allocation5 + $0x8e8] sm:$0xf0] }
  0xfb   :  { %2669 = vmatpush.bf16.msrb.mxu1 %v3706_v31  ;;  %v5349_v31 = vld [vmem:[#allocation5 + $0x990] sm:$0xf0]  ;;  %v4601_v16 = vld [vmem:[#allocation5 + $0x8d0] sm:$0xf]  ;;  %v4295_v0 = vld [vmem:[#allocation5 + $0x684] sm:$0xf0] }
  0xfc   :  { %2682 = vmatpush.bf16.msrb.mxu2 %v3930_v36  ;;  %v3822_v36 = vor.u32 %v5129_v26, %v3819_v27  ;;  %v3738_v27 = vor.u32 %v5108_v8, %v3735_v9  ;;  %v5185_v9 = vld [vmem:[#allocation5 + $0x474] sm:$0xf] }
  0xfd   :  { %2656 = vmatpush.bf16.msrb.mxu3 %v3482_v11  ;;  %2696 = vmatmul.bf16.vlgmr.msrb.gmra.mxu0 %v5664_v18  ;;  %v4685_v11 = vld [vmem:[#allocation5 + $0x978] sm:$0xf] }
  0xfe   :  { %2740 = vmatpush.bf16.msra.mxu0 %v3682_v44  ;;  %2670 = vmatmul.bf16.vlgmr.msrb.gmra.mxu1 %v5666_v19  ;;  %v2413_v44 = vpop.f32.mrf.mxu0 }
  0xff   :  { %2714 = vmatpush.bf16.msra.mxu1 %v4798_v40  ;;  %2683 = vmatmul.bf16.vlgmr.msrb.gmra.mxu2 %v5659_v53  ;;  %v2437_v35 = vpop.f32.mrf.mxu3  ;;  %v4686_v40 = vor.u32 %v5349_v31, %v4685_v11  ;;  %v4378_v11 = vor.u32 %v5272_v15, %v4377_v14  ;;  %v4602_v31 = vor.u32 %v5328_v20, %v4601_v16  ;;  %v5255_v44 = vld [vmem:[#allocation5 + $0x6a4] sm:$0xf]  ;;  %v4267_v15 = vld [vmem:[#allocation5 + $0x64c] sm:$0xf0]  ;;  %v5297_v16 = vld [vmem:[#allocation5 + $0x7f4] sm:$0xf] }
 0x100   :  { %2734 = vmatpush.bf16.msra.mxu2 %v4826_v46  ;;  %2657 = vmatmul.bf16.vlgmr.msrb.gmra.mxu3 %v5662_v12  ;;  %v2438_v37 = vadd.f32 %v2437_v35, %v2425_v22  ;;  %v3570_v46 = vor.u32 %v5066_v32, %v3567_v34  ;;  %v3483_v22 = vld [vmem:[#allocation5 + $0x2c] sm:$0xf0]  ;;  %v5101_v32 = vld [vmem:[#allocation5 + $0x1d4] sm:$0xf] }
 0x101   :  { %2701 = vmatpush.bf16.msra.mxu3 %v4574_v39  ;;  %v4462_v39 = vor.u32 %v5293_v29, %v4461_v28  ;;  %v4351_v28 = vld [vmem:[#allocation5 + $0x6f4] sm:$0xf0]  ;;  %v3707_v34 = vld [vmem:[#allocation5 + $0x1ec] sm:$0xf0]  ;;  %v3486_v35 = vor.u32 %v5045_v21, %v3483_v22  ;;  %v505_v22 = vperm.slane %v5699_v7, 2 }
 0x102   :  { %2741 = vmatpush.bf16.msra.mxu0 %v3654_v60  ;;  %v2450_v50 = vpop.f32.mrf.mxu2  ;;  %v5115_v60 = vld [vmem:[#allocation5 + $0x244] sm:$0xf]  ;;  %v4575_v29 = vld [vmem:[#allocation5 + $0x8b4] sm:$0xf0]  ;;  %v3710_v47 = vor.u32 %v5101_v32, %v3707_v34  ;;  %v5290_v32 = vld [vmem:[#allocation5 + $0x7bc] sm:$0xf] }
 0x103   :  { %2715 = vmatpush.bf16.msra.mxu1 %v4770_v55  ;;  %v5721_v55 = vadd.f32 %v2450_v50, %v2438_v37  ;;  %v3766_v6 = vor.u32 %v5115_v60, %v3763_v61  ;;  %v5374_v37 = vld [vmem:[#allocation5 + $0xa5c] sm:$0xf]  ;;  %v4547_v50 = vld [vmem:[#allocation5 + $0x87c] sm:$0xf0]  ;;  %v5192_v61 = vld [vmem:[#allocation5 + $0x4ac] sm:$0xf] }
 0x104   :  { %2753 = vmatpush.bf16.msrb.mxu2 %v3906_v52  ;;  %v3539_v52 = vld [vmem:[#allocation5 + $0x9c] sm:$0xf0]  ;;  %v4550_v60 = vor.u32 %v5311_v49, %v4547_v50  ;;  %v4463_v34 = vld [vmem:[#allocation5 + $0x7d4] sm:$0xf0] }
 0x105   :  { %2702 = vmatpush.bf16.msra.mxu3 %v4546_v54  ;;  %v2426_v54 = vpop.f32.mrf.mxu1  ;;  %v3542_v63 = vor.u32 %v5059_v51, %v3539_v52  ;;  %v4435_v49 = vld [vmem:[#allocation5 + $0x79c] sm:$0xf0] }
 0x106   :  { %2742 = vmatpush.bf16.msra.mxu0 %v3626_v13  ;;  %v4102_v54 = vor.u32 %v5199_v42, %v4099_v43  ;;  %v5171_v42 = vld [vmem:[#allocation5 + $0x404] sm:$0xf]  ;;  %v3987_v43 = vld [vmem:[#allocation5 + $0x41c] sm:$0xf0] }
 0x107   :  { %2716 = vmatpush.bf16.msra.mxu1 %v4742_v5  ;;  %v2439_v5 = vpop.f32.mrf.mxu3 }
 0x108   :  { %2754 = vmatpush.bf16.msrb.mxu2 %v3878_v2  ;;  %v5335_v2 = vld [vmem:[#allocation5 + $0x920] sm:$0xf0]  ;;  %v4743_v5 = vld [vmem:[#allocation5 + $0xa04] sm:$0xf0] }
 0x109   :  { %2703 = vmatpush.bf16.msra.mxu3 %v4518_v4  ;;  %v3511_v4 = vld [vmem:[#allocation5 + $0x64] sm:$0xf0]  ;;  %v4630_v13 = vor.u32 %v5335_v2, %v4629_v1  ;;  %v5304_v1 = vld [vmem:[#allocation5 + $0x82c] sm:$0xf] }
 0x10a   :  { %2743 = vmatpush.bf16.msra.mxu0 %v3598_v57  ;;  %v3514_v17 = vor.u32 %v5052_v3, %v3511_v4  ;;  %v2452_v26 = vpop.f32.mrf.mxu2  ;;  %v5318_v57 = vld [vmem:[#allocation5 + $0x89c] sm:$0xf]  ;;  %v4074_v3 = vor.u32 %v5192_v61, %v4071_v62  ;;  %v5360_v4 = vld [vmem:[#allocation5 + $0x9ec] sm:$0xf] }
 0x10b   :  { %2717 = vmatpush.bf16.msra.mxu1 %v4714_v25  ;;  %v5262_v25 = vld [vmem:[#allocation5 + $0x6dc] sm:$0xf]  ;;  %v4578_v41 = vor.u32 %v5318_v57, %v4575_v29  ;;  %v4746_v21 = vor.u32 %v5360_v4, %v4743_v5  ;;  %v4015_v29 = vld [vmem:[#allocation5 + $0x454] sm:$0xf0]  ;;  %v5276_v4 = vld [vmem:[#allocation5 + $0x74c] sm:$0xf] }
 0x10c   :  { %2755 = vmatpush.bf16.msrb.mxu2 %v3850_v23  ;;  %v5206_v23 = vld [vmem:[#allocation5 + $0x51c] sm:$0xf]  ;;  %v4407_v5 = vld [vmem:[#allocation5 + $0x764] sm:$0xf0] }
 0x10d   :  { %2704 = vmatpush.bf16.msra.mxu3 %v4490_v24  ;;  %v4127_v24 = vld [vmem:[#allocation5 + $0x534] sm:$0xf0]  ;;  %v5178_v57 = vld [vmem:[#allocation5 + $0x43c] sm:$0xf] }
 0x10e   :  { %2744 = vmatpush.bf16.msra.mxu0 %v3570_v46  ;;  %v4018_v7 = vor.u32 %v5178_v57, %v4015_v29  ;;  %v4133_v57 = vld [vmem:[#allocation5 + $0x520] sm:$0xf]  ;;  %v5210_v29 = vld [vmem:[#allocation5 + $0x538] sm:$0xf0] }
 0x10f   :  { %2718 = vmatpush.bf16.msra.mxu1 %v4686_v40  ;;  %4839 = vmatmul.msk.bf16.vlgmr.msra.gmra.mxu2 %vm2281_vm0, %v5671_v45  ;;  %v4354_v40 = vor.u32 %v5262_v25, %v4351_v28  ;;  %v2463_v46 = vpop.f32.mrf.mxu3  ;;  %v4715_v25 = vld [vmem:[#allocation5 + $0x9cc] sm:$0xf0] }
 0x110   :  { %2756 = vmatpush.bf16.msrb.mxu2 %v3822_v36  ;;  %v4130_v36 = vor.u32 %v5206_v23, %v4127_v24  ;;  %v5726_v51 = vadd.f32 %v2463_v46, %v5721_v55  ;;  %v4519_v55 = vld [vmem:[#allocation5 + $0x844] sm:$0xf0]  ;;  %v5353_v24 = vld [vmem:[#allocation5 + $0x9b4] sm:$0xf] }
 0x111   :  { %2705 = vmatpush.bf16.msra.mxu3 %v4462_v39  ;;  %v4799_v39 = vld [vmem:[#allocation5 + $0xa74] sm:$0xf0]  ;;  %v4522_v8 = vor.u32 %v5304_v1, %v4519_v55  ;;  %v3959_v1 = vld [vmem:[#allocation5 + $0x3e4] sm:$0xf0]  ;;  %v5220_v55 = vld [vmem:[#allocation5 + $0x58c] sm:$0xf] }
 0x112   :  { %2745 = vmatpush.bf16.msra.mxu0 %v3542_v63  ;;  %v4802_v52 = vor.u32 %v5374_v37, %v4799_v39  ;;  %v5248_v63 = vld [vmem:[#allocation5 + $0x66c] sm:$0xf]  ;;  %v5346_v37 = vld [vmem:[#allocation5 + $0x97c] sm:$0xf]  ;;  %v4687_v39 = vld [vmem:[#allocation5 + $0x994] sm:$0xf0] }
 0x113   :  { %2719 = vmatpush.bf16.msra.mxu1 %v4658_v59  ;;  %v4326_v59 = vor.u32 %v5255_v44, %v4323_v48  ;;  %v5227_v44 = vld [vmem:[#allocation5 + $0x5c4] sm:$0xf] }
 0x114   :  { %2757 = vmatpush.bf16.msrb.mxu2 %v3794_v56  ;;  %v5367_v56 = vld [vmem:[#allocation5 + $0xa24] sm:$0xf] }
 0x115   :  { %2706 = vmatpush.bf16.msra.mxu3 %v4434_v58  ;;  %v4771_v58 = vld [vmem:[#allocation5 + $0xa3c] sm:$0xf0]  ;;  %v5283_v48 = vld [vmem:[#allocation5 + $0x784] sm:$0xf] }
 0x116   :  { %2746 = vmatpush.bf16.msra.mxu0 %v3514_v17  ;;  %v4774_v2 = vor.u32 %v5367_v56, %v4771_v58  ;;  %v2502_v14 = vpop.f32.mrf.mxu0  ;;  %v4491_v17 = vld [vmem:[#allocation5 + $0x80c] sm:$0xf0]  ;;  %v3990_v58 = vor.u32 %v5171_v42, %v3987_v43  ;;  %v4134_v42 = vor.u32 %v5210_v29, %v4133_v57  ;;  %v3909_v43 = vld [vmem:[#allocation5 + $0x360] sm:$0xf] }
 0x117   :  { %2720 = vmatpush.bf16.msra.mxu1 %v4630_v13  ;;  %v5241_v13 = vld [vmem:[#allocation5 + $0x634] sm:$0xf]  ;;  %v2465_v20 = vpop.f32.mrf.mxu3  ;;  %v2476_v26 = vpop.f32.mrf.mxu1  ;;  %v4494_v28 = vor.u32 %v5297_v16, %v4491_v17  ;;  %v4410_v17 = vor.u32 %v5276_v4, %v4407_v5 }
 0x118   :  { %2758 = vmatpush.bf16.msrb.mxu2 %v3766_v6  ;;  %v4298_v6 = vor.u32 %v5248_v63, %v4295_v0  ;;  %v4438_v63 = vor.u32 %v5283_v48, %v4435_v49  ;;  %v5164_v0 = vld [vmem:[#allocation5 + $0x3cc] sm:$0xf]  ;;  %v3931_v20 = vld [vmem:[#allocation5 + $0x3ac] sm:$0xf0]  ;;  %v5091_v48 = vld [vmem:[#allocation5 + $0x180] sm:$0xf0] }
 0x119   :  { %2707 = vmatpush.bf16.msra.mxu3 %v4406_v10  ;;  %v4043_v10 = vld [vmem:[#allocation5 + $0x48c] sm:$0xf0]  ;;  %v4105_v49 = vld [vmem:[#allocation5 + $0x4e8] sm:$0xf] }
 0x11a   :  { %2747 = vmatpush.bf16.msra.mxu0 %v3486_v35  ;;  %v4046_v23 = vor.u32 %v5185_v9, %v4043_v10  ;;  %v4718_v35 = vor.u32 %v5353_v24, %v4715_v25  ;;  %v3962_v9 = vor.u32 %v5164_v0, %v3959_v1  ;;  %v5332_v10 = vld [vmem:[#allocation5 + $0x90c] sm:$0xf]  ;;  %v4379_v24 = vld [vmem:[#allocation5 + $0x72c] sm:$0xf0]  ;;  %v3685_v25 = vld [vmem:[#allocation5 + $0x1a0] sm:$0xf] }
 0x11b   :  { %2721 = vmatpush.bf16.msra.mxu1 %v4602_v31  ;;  %v4239_v31 = vld [vmem:[#allocation5 + $0x614] sm:$0xf0]  ;;  %v5147_v0 = vld [vmem:[#allocation5 + $0x340] sm:$0xf0]  ;;  %v3629_v1 = vld [vmem:[#allocation5 + $0x130] sm:$0xf] }
 0x11c   :  { %2759 = vmatpush.bf16.msrb.mxu2 %v3738_v27  ;;  %v4270_v27 = vor.u32 %v5241_v13, %v4267_v15  ;;  %v4631_v13 = vld [vmem:[#allocation5 + $0x924] sm:$0xf0]  ;;  %v5157_v15 = vld [vmem:[#allocation5 + $0x394] sm:$0xf] }
 0x11d   :  { %2708 = vmatpush.bf16.msra.mxu3 %v4378_v11  ;;  %2748 = vmatmul.bf16.vlgmr.msra.gmra.mxu0 %v5662_v12  ;;  %v5234_v11 = vld [vmem:[#allocation5 + $0x5fc] sm:$0xf] }
 0x11e   :  { %2792 = vmatpush.bf16.msrb.mxu0 %v4578_v41  ;;  %2722 = vmatmul.bf16.vlgmr.msra.gmra.mxu1 %v5677_v38  ;;  %v4466_v41 = vor.u32 %v5290_v32, %v4463_v34  ;;  %v2504_v46 = vpop.f32.mrf.mxu0  ;;  %v5325_v32 = vld [vmem:[#allocation5 + $0x8d4] sm:$0xf]  ;;  %v4603_v34 = vld [vmem:[#allocation5 + $0x8ec] sm:$0xf0] }
 0x11f   :  { %2779 = vmatpush.bf16.msrb.mxu1 %v4354_v40  ;;  %v4242_v40 = vor.u32 %v5234_v11, %v4239_v31  ;;  %v2478_v61 = vpop.f32.mrf.mxu1  ;;  %v3934_v31 = vor.u32 %v5157_v15, %v3931_v20  ;;  %v3657_v46 = vld [vmem:[#allocation5 + $0x168] sm:$0xf]  ;;  %v3601_v20 = vld [vmem:[#allocation5 + $0xf8] sm:$0xf] }
 0x120   :  { %2709 = vmatmul.bf16.vlgmr.msra.gmra.mxu3 %v5675_v33  ;;  %2760 = vmatpush.bf16.msrb.mxu2 %v3710_v47  ;;  %v4211_v47 = vld [vmem:[#allocation5 + $0x5dc] sm:$0xf0]  ;;  %v3658_v61 = vor.u32 %v5091_v48, %v3657_v46  ;;  %v3545_v46 = vld [vmem:[#allocation5 + $0x88] sm:$0xf]  ;;  %v5063_v48 = vld [vmem:[#allocation5 + $0xa0] sm:$0xf0] }
 0x121   :  { %2766 = vmatpush.bf16.msrb.mxu3 %v4130_v36  ;;  %v2477_v36 = vadd.f32 %v2476_v26, %v505_v22  ;;  %v4214_v62 = vor.u32 %v5227_v44, %v4211_v47  ;;  %v4155_v22 = vld [vmem:[#allocation5 + $0x56c] sm:$0xf0]  ;;  %v5154_v44 = vld [vmem:[#allocation5 + $0x378] sm:$0xf0]  ;;  %v4606_v47 = vor.u32 %v5325_v32, %v4603_v34  ;;  %v4021_v34 = vld [vmem:[#allocation5 + $0x440] sm:$0xf] }
 0x122   :  { %2793 = vmatpush.bf16.msrb.mxu0 %v4550_v60  ;;  %v2515_v56 = vpop.f32.mrf.mxu2  ;;  %v4659_v60 = vld [vmem:[#allocation5 + $0x95c] sm:$0xf0]  ;;  %v5070_v32 = vld [vmem:[#allocation5 + $0xd8] sm:$0xf0] }
 0x123   :  { %2780 = vmatpush.bf16.msrb.mxu1 %v4326_v59  ;;  %2761 = vmatmul.bf16.vlgmr.msrb.gmra.mxu2 %v5666_v19  ;;  %v2489_v50 = vpop.f32.mrf.mxu3  ;;  %v5339_v59 = vld [vmem:[#allocation5 + $0x944] sm:$0xf] }
 0x124   :  { %2805 = vmatpush.bf16.msra.mxu2 %v4802_v52  ;;  %v4690_v52 = vor.u32 %v5346_v37, %v4687_v39  ;;  %v4827_v37 = vld [vmem:[#allocation5 + $0xaac] sm:$0xf0]  ;;  %v4357_v39 = vld [vmem:[#allocation5 + $0x6e0] sm:$0xf] }
 0x125   :  { %2767 = vmatpush.bf16.msrb.mxu3 %v4102_v54  ;;  %v2490_v54 = vadd.f32 %v2489_v50, %v2477_v36  ;;  %v5203_v50 = vld [vmem:[#allocation5 + $0x500] sm:$0xf0] }
 0x126   :  { %2794 = vmatpush.bf16.msrb.mxu0 %v4522_v8 }
 0x127   :  { %2781 = vmatpush.bf16.msrb.mxu1 %v4298_v6  ;;  %v4662_v6 = vor.u32 %v5339_v59, %v4659_v60  ;;  %v5259_v59 = vld [vmem:[#allocation5 + $0x6c0] sm:$0xf0] }
 0x128   :  { %2806 = vmatpush.bf16.msra.mxu2 %v4774_v2  ;;  %v2503_v2 = vadd.f32 %v2502_v14, %v2490_v54  ;;  %v5735_v14 = vpop.f32.mrf.mxu0 }
 0x129   :  { %2768 = vmatpush.bf16.msrb.mxu3 %v4074_v3  ;;  %v4183_v3 = vld [vmem:[#allocation5 + $0x5a4] sm:$0xf0] }
 0x12a   :  { %2795 = vmatpush.bf16.msrb.mxu0 %v4494_v28  ;;  %v5733_v8 = vadd.f32 %v2515_v56, %v2503_v2  ;;  %v4186_v16 = vor.u32 %v5220_v55, %v4183_v3  ;;  %v5098_v28 = vld [vmem:[#allocation5 + $0x1b8] sm:$0xf0]  ;;  %v2517_v11 = vpop.f32.mrf.mxu2  ;;  %v3910_v56 = vor.u32 %v5154_v44, %v3909_v43  ;;  %v5084_v55 = vld [vmem:[#allocation5 + $0x148] sm:$0xf0]  ;;  %v4077_v2 = vld [vmem:[#allocation5 + $0x4b0] sm:$0xf] }
 0x12b   :  { %2782 = vmatpush.bf16.msrb.mxu1 %v4270_v27  ;;  %v2491_v26 = vpop.f32.mrf.mxu3  ;;  %v4634_v27 = vor.u32 %v5332_v10, %v4631_v13  ;;  %v5196_v3 = vld [vmem:[#allocation5 + $0x4c8] sm:$0xf0]  ;;  %v3630_v13 = vor.u32 %v5084_v55, %v3629_v1  ;;  %v3825_v11 = vld [vmem:[#allocation5 + $0x2b8] sm:$0xf]  ;;  %v3797_v43 = vld [vmem:[#allocation5 + $0x280] sm:$0xf] }
 0x12c   :  { %2807 = vmatpush.bf16.msra.mxu2 %v4746_v21  ;;  %v5213_v21 = vld [vmem:[#allocation5 + $0x554] sm:$0xf]  ;;  %v4078_v15 = vor.u32 %v5196_v3, %v4077_v2  ;;  %v5126_v44 = vld [vmem:[#allocation5 + $0x298] sm:$0xf0]  ;;  %v5119_v1 = vld [vmem:[#allocation5 + $0x260] sm:$0xf0] }
 0x12d   :  { %2769 = vmatpush.bf16.msrb.mxu3 %v4046_v23  ;;  %v5269_v23 = vld [vmem:[#allocation5 + $0x714] sm:$0xf]  ;;  %v4158_v36 = vor.u32 %v5213_v21, %v4155_v22  ;;  %v3517_v55 = vld [vmem:[#allocation5 + $0x50] sm:$0xf]  ;;  %v5056_v3 = vld [vmem:[#allocation5 + $0x68] sm:$0xf0] }
 0x12e   :  { %2796 = vmatpush.bf16.msrb.mxu0 %v4466_v41  ;;  %v3686_v41 = vor.u32 %v5098_v28, %v3685_v25  ;;  %v5077_v22 = vld [vmem:[#allocation5 + $0x110] sm:$0xf0] }
 0x12f   :  { %2783 = vmatpush.bf16.msrb.mxu1 %v4242_v40  ;;  %v5266_v40 = vld [vmem:[#allocation5 + $0x6f8] sm:$0xf0]  ;;  %v5245_v28 = vld [vmem:[#allocation5 + $0x650] sm:$0xf0]  ;;  %v3602_v57 = vor.u32 %v5077_v22, %v3601_v20  ;;  %v3489_v22 = vld [vmem:[#allocation5 + $0x18] sm:$0xf] }
 0x130   :  { %2808 = vmatpush.bf16.msra.mxu2 %v4718_v35  ;;  %v5381_v35 = vld [vmem:[#allocation5 + $0xa94] sm:$0xf]  ;;  %v4358_v54 = vor.u32 %v5266_v40, %v4357_v39  ;;  %v2556_v60 = vpop.f32.mrf.mxu0  ;;  %v4245_v39 = vld [vmem:[#allocation5 + $0x600] sm:$0xf]  ;;  %v5238_v40 = vld [vmem:[#allocation5 + $0x618] sm:$0xf0] }
 0x131   :  { %2770 = vmatpush.bf16.msrb.mxu3 %v4018_v7  ;;  %v4382_v7 = vor.u32 %v5269_v23, %v4379_v24  ;;  %v4049_v23 = vld [vmem:[#allocation5 + $0x478] sm:$0xf]  ;;  %v5189_v24 = vld [vmem:[#allocation5 + $0x490] sm:$0xf0]  ;;  %v4217_v60 = vld [vmem:[#allocation5 + $0x5c8] sm:$0xf] }
 0x132   :  { %2797 = vmatpush.bf16.msrb.mxu0 %v4438_v63  ;;  %v3881_v63 = vld [vmem:[#allocation5 + $0x328] sm:$0xf]  ;;  %v4050_v29 = vor.u32 %v5189_v24, %v4049_v23  ;;  %v5049_v23 = vld [vmem:[#allocation5 + $0x30] sm:$0xf0] }
 0x133   :  { %2784 = vmatpush.bf16.msrb.mxu1 %v4214_v62  ;;  %v4106_v62 = vor.u32 %v5203_v50, %v4105_v49  ;;  %v3882_v5 = vor.u32 %v5147_v0, %v3881_v63  ;;  %v3993_v49 = vld [vmem:[#allocation5 + $0x408] sm:$0xf]  ;;  %v5175_v50 = vld [vmem:[#allocation5 + $0x420] sm:$0xf0]  ;;  %v5161_v24 = vld [vmem:[#allocation5 + $0x3b0] sm:$0xf0] }
 0x134   :  { %2809 = vmatpush.bf16.msra.mxu2 %v4690_v52  ;;  %v4830_v52 = vor.u32 %v5381_v35, %v4827_v37  ;;  %v5182_v35 = vld [vmem:[#allocation5 + $0x458] sm:$0xf0]  ;;  %v3994_v63 = vor.u32 %v5175_v50, %v3993_v49  ;;  %v3769_v0 = vld [vmem:[#allocation5 + $0x248] sm:$0xf] }
 0x135   :  { %2771 = vmatpush.bf16.msrb.mxu3 %v3990_v58  ;;  %v4329_v58 = vld [vmem:[#allocation5 + $0x6a8] sm:$0xf]  ;;  %v5393_v49 = vld [vmem:[#allocation8 + $0x38] sm:$0xff] }
 0x136   :  { %2798 = vmatpush.bf16.msrb.mxu0 %v4410_v17  ;;  %v4330_v4 = vor.u32 %v5259_v59, %v4329_v58  ;;  %v5140_v17 = vld [vmem:[#allocation5 + $0x308] sm:$0xf0]  ;;  %v3798_v59 = vor.u32 %v5126_v44, %v3797_v43  ;;  %v4553_v44 = vld [vmem:[#allocation5 + $0x868] sm:$0xf]  ;;  %v5401_v50 = vld [vmem:[#allocation8 + $0x78] sm:$0xff] }
 0x137   :  { %2785 = vmatpush.bf16.msrb.mxu1 %v4186_v16  ;;  %v2528_v10 = vpop.f32.mrf.mxu1  ;;  %v3853_v16 = vld [vmem:[#allocation5 + $0x2f0] sm:$0xf] }
 0x138   :  { %2810 = vmatpush.bf16.msra.mxu2 %v4662_v6  ;;  %v4301_v6 = vld [vmem:[#allocation5 + $0x670] sm:$0xf]  ;;  %v2529_v21 = vadd.f32 %v2528_v10, %v5733_v8  ;;  %v3854_v26 = vor.u32 %v5140_v17, %v3853_v16  ;;  %v3573_v8 = vld [vmem:[#allocation5 + $0xc0] sm:$0xf]  ;;  %v3770_v10 = vor.u32 %v5119_v1, %v3769_v0  ;;  %v5224_v16 = vld [vmem:[#allocation5 + $0x5a8] sm:$0xf0]  ;;  %v3518_v17 = vor.u32 %v5056_v3, %v3517_v55 }
 0x139   :  { %2772 = vmatpush.bf16.msrb.mxu3 %v3962_v9  ;;  %v5252_v9 = vld [vmem:[#allocation5 + $0x688] sm:$0xf0]  ;;  %v4749_v1 = vld [vmem:[#allocation5 + $0x9f0] sm:$0xf] }
 0x13a   :  { %2799 = vmatpush.bf16.msrb.mxu0 %v4382_v7  ;;  %v4302_v25 = vor.u32 %v5252_v9, %v4301_v6  ;;  %v5364_v55 = vld [vmem:[#allocation5 + $0xa08] sm:$0xf0] }
 0x13b   :  { %2786 = vmatpush.bf16.msrb.mxu1 %v4158_v36  ;;  %v5742_v36 = vpop.f32.mrf.mxu0 }
 0x13c   :  { %2811 = vmatpush.bf16.msra.mxu2 %v4634_v27  ;;  %v4273_v27 = vld [vmem:[#allocation5 + $0x638] sm:$0xf] }
 0x13d   :  { %2773 = vmatpush.bf16.msrb.mxu3 %v3934_v31  ;;  %2800 = vmatmul.bf16.vlgmr.msrb.gmra.mxu0 %v5675_v33  ;;  %v5133_v31 = vld [vmem:[#allocation5 + $0x2d0] sm:$0xf0]  ;;  %v4274_v7 = vor.u32 %v5245_v28, %v4273_v27  ;;  %v5322_v27 = vld [vmem:[#allocation5 + $0x8b8] sm:$0xf0]  ;;  %v4833_v28 = vld [vmem:[#allocation5 + $0xa98] sm:$0xf] }
 0x13e   :  { %2857 = vmatpush.bf16.msra.mxu0 %v4134_v42  ;;  %2787 = vmatmul.bf16.vlgmr.msrb.gmra.mxu1 %v5664_v18  ;;  %v3826_v37 = vor.u32 %v5133_v31, %v3825_v11  ;;  %v4022_v42 = vor.u32 %v5182_v35, %v4021_v34  ;;  %v3490_v34 = vor.u32 %v5049_v23, %v3489_v22  ;;  %v4693_v22 = vld [vmem:[#allocation5 + $0x980] sm:$0xf]  ;;  %v5350_v23 = vld [vmem:[#allocation5 + $0x998] sm:$0xf0] }
 0x13f   :  { %2831 = vmatpush.bf16.msra.mxu1 %v3686_v41  ;;  %v3574_v41 = vor.u32 %v5070_v32, %v3573_v8  ;;  %v4161_v8 = vld [vmem:[#allocation5 + $0x558] sm:$0xf]  ;;  %v5217_v32 = vld [vmem:[#allocation5 + $0x570] sm:$0xf0] }
 0x140   :  { %2774 = vmatmul.bf16.vlgmr.msrb.gmra.mxu3 %v5659_v53  ;;  %2812 = vmatpush.bf16.msra.mxu2 %v4606_v47  ;;  %v2530_v47 = vpop.f32.mrf.mxu1  ;;  %v4162_v43 = vor.u32 %v5217_v32, %v4161_v8  ;;  %v5343_v8 = vld [vmem:[#allocation5 + $0x960] sm:$0xf0]  ;;  %v4413_v32 = vld [vmem:[#allocation5 + $0x750] sm:$0xf] }
 0x141   :  { %2825 = vmatpush.bf16.msra.mxu3 %v4830_v52 }
 0x142   :  { %2858 = vmatpush.bf16.msra.mxu0 %v4106_v62  ;;  %v3546_v62 = vor.u32 %v5063_v48, %v3545_v46  ;;  %v5315_v46 = vld [vmem:[#allocation5 + $0x880] sm:$0xf0] }
 0x143   :  { %2832 = vmatpush.bf16.msra.mxu1 %v3658_v61  ;;  %2813 = vmatmul.bf16.vlgmr.msra.gmra.mxu2 %v5677_v38  ;;  %v2541_v52 = vpop.f32.mrf.mxu3  ;;  %v5231_v61 = vld [vmem:[#allocation5 + $0x5e0] sm:$0xf0]  ;;  %v2582_v6 = vpop.f32.mrf.mxu0 }
 0x144   :  { %2870 = vmatpush.bf16.msrb.mxu2 %v4358_v54  ;;  %v4246_v54 = vor.u32 %v5238_v40, %v4245_v39  ;;  %v2542_v58 = vadd.f32 %v2541_v52, %v2529_v21  ;;  %v4218_v9 = vor.u32 %v5231_v61, %v4217_v60  ;;  %v5112_v21 = vld [vmem:[#allocation5 + $0x228] sm:$0xf0]  ;;  %v4554_v52 = vor.u32 %v5315_v46, %v4553_v44  ;;  %v4385_v44 = vld [vmem:[#allocation5 + $0x718] sm:$0xf]  ;;  %v5273_v46 = vld [vmem:[#allocation5 + $0x730] sm:$0xf0] }
 0x145   :  { %2844 = vmatpush.bf16.msrb.mxu3 %v3910_v56  ;;  %v5744_v56 = vpop.f32.mrf.mxu2  ;;  %v5308_v60 = vld [vmem:[#allocation5 + $0x848] sm:$0xf0] }
 0x146   :  { %2859 = vmatpush.bf16.msra.mxu0 %v4078_v15  ;;  %v5749_v2 = vadd.f32 %v5735_v14, %v2542_v58  ;;  %v4189_v15 = vld [vmem:[#allocation5 + $0x590] sm:$0xf]  ;;  %v3937_v14 = vld [vmem:[#allocation5 + $0x398] sm:$0xf]  ;;  %v5371_v58 = vld [vmem:[#allocation5 + $0xa40] sm:$0xf0] }
 0x147   :  { %2833 = vmatpush.bf16.msra.mxu1 %v3630_v13  ;;  %v3741_v13 = vld [vmem:[#allocation5 + $0x210] sm:$0xf]  ;;  %v3938_v35 = vor.u32 %v5161_v24, %v3937_v14  ;;  %v5391_v6 = vld [vmem:[#allocation8 + $0x28] sm:$0xff] }
 0x148   :  { %2871 = vmatpush.bf16.msrb.mxu2 %v4330_v4  ;;  %v3965_v4 = vld [vmem:[#allocation5 + $0x3d0] sm:$0xf]  ;;  %v3742_v31 = vor.u32 %v5112_v21, %v3741_v13  ;;  %v4721_v13 = vld [vmem:[#allocation5 + $0x9b8] sm:$0xf]  ;;  %v4441_v24 = vld [vmem:[#allocation5 + $0x788] sm:$0xf] }
 0x149   :  { %2845 = vmatpush.bf16.msrb.mxu3 %v3882_v5  ;;  %v5168_v5 = vld [vmem:[#allocation5 + $0x3e8] sm:$0xf0] }
 0x14a   :  { %2860 = vmatpush.bf16.msra.mxu0 %v4050_v29  ;;  %v3966_v20 = vor.u32 %v5168_v5, %v3965_v4  ;;  %v4497_v4 = vld [vmem:[#allocation5 + $0x7f8] sm:$0xf]  ;;  %v5301_v5 = vld [vmem:[#allocation5 + $0x810] sm:$0xf0] }
 0x14b   :  { %2834 = vmatpush.bf16.msra.mxu1 %v3602_v57  ;;  %v5385_v57 = vld [vmem:[#allocation5 + $0xab0] sm:$0xf0]  ;;  %v2543_v29 = vpop.f32.mrf.mxu3 }
 0x14c   :  { %2872 = vmatpush.bf16.msrb.mxu2 %v4302_v25  ;;  %v4581_v25 = vld [vmem:[#allocation5 + $0x8a0] sm:$0xf]  ;;  %v4834_v40 = vor.u32 %v5385_v57, %v4833_v28  ;;  %v5389_v28 = vld [vmem:[#allocation8 + $0x18] sm:$0xff] }
 0x14d   :  { %2846 = vmatpush.bf16.msrb.mxu3 %v3854_v26  ;;  %v4190_v26 = vor.u32 %v5224_v16, %v4189_v15  ;;  %v2569_v11 = vpop.f32.mrf.mxu2  ;;  %v4582_v39 = vor.u32 %v5322_v27, %v4581_v25  ;;  %v5357_v15 = vld [vmem:[#allocation5 + $0x9d0] sm:$0xf0]  ;;  %v4469_v16 = vld [vmem:[#allocation5 + $0x7c0] sm:$0xf]  ;;  %v5287_v25 = vld [vmem:[#allocation5 + $0x7a0] sm:$0xf0]  ;;  %v4694_v27 = vor.u32 %v5350_v23, %v4693_v22 }
 0x14e   :  { %2861 = vmatpush.bf16.msra.mxu0 %v4022_v42  ;;  %v5378_v42 = vld [vmem:[#allocation5 + $0xa78] sm:$0xf0]  ;;  %v4442_v11 = vor.u32 %v5287_v25, %v4441_v24 }
 0x14f   :  { %2835 = vmatpush.bf16.msra.mxu1 %v3574_v41  ;;  %v4805_v41 = vld [vmem:[#allocation5 + $0xa60] sm:$0xf]  ;;  %v5397_v29 = vld [vmem:[#allocation8 + $0x58] sm:$0xff] }
 0x150   :  { %2873 = vmatpush.bf16.msrb.mxu2 %v4274_v7  ;;  %4840 = vmatmul.msk.bf16.vlgmr.msra.gmra.mxu3 %vm2281_vm0, %v5671_v45  ;;  %v3713_v7 = vld [vmem:[#allocation5 + $0x1d8] sm:$0xf]  ;;  %v4806_v48 = vor.u32 %v5378_v42, %v4805_v41  ;;  %v4637_v41 = vld [vmem:[#allocation5 + $0x910] sm:$0xf]  ;;  %v5336_v42 = vld [vmem:[#allocation5 + $0x928] sm:$0xf0] }
 0x151   :  { %2847 = vmatpush.bf16.msrb.mxu3 %v3826_v37  ;;  %v5105_v37 = vld [vmem:[#allocation5 + $0x1f0] sm:$0xf0]  ;;  %v5413_v23 = vld [vmem:[#allocation8 + $0xd8] sm:$0xff] }
 0x152   :  { %2862 = vmatpush.bf16.msra.mxu0 %v3994_v63  ;;  %v3714_v47 = vor.u32 %v5105_v37, %v3713_v7  ;;  %v5400_v63 = vld [vmem:[#allocation8 + $0x70] sm:$0xff] }
 0x153   :  { %2836 = vmatpush.bf16.msra.mxu1 %v3546_v62  ;;  %v5392_v62 = vld [vmem:[#allocation8 + $0x30] sm:$0xff] }
 0x154   :  { %2874 = vmatpush.bf16.msrb.mxu2 %v4246_v54  ;;  %v4777_v54 = vld [vmem:[#allocation5 + $0xa28] sm:$0xf]  ;;  %v5388_v37 = vld [vmem:[#allocation8 + $0x10] sm:$0xff] }
 0x155   :  { %2848 = vmatpush.bf16.msrb.mxu3 %v3798_v59  ;;  %v4525_v59 = vld [vmem:[#allocation5 + $0x830] sm:$0xf]  ;;  %v4778_v61 = vor.u32 %v5371_v58, %v4777_v54  ;;  %v4609_v54 = vld [vmem:[#allocation5 + $0x8d8] sm:$0xf]  ;;  %v5329_v58 = vld [vmem:[#allocation5 + $0x8f0] sm:$0xf0] }
 0x156   :  { %2863 = vmatpush.bf16.msra.mxu0 %v3966_v20  ;;  %v4526_v0 = vor.u32 %v5308_v60, %v4525_v59  ;;  %v5409_v59 = vld [vmem:[#allocation8 + $0xb8] sm:$0xff] }
 0x157   :  { %2837 = vmatpush.bf16.msra.mxu1 %v3518_v17  ;;  %v5752_v3 = vpop.f32.mrf.mxu1  ;;  %v5294_v17 = vld [vmem:[#allocation5 + $0x7d8] sm:$0xf0] }
 0x158   :  { %2875 = vmatpush.bf16.msrb.mxu2 %v4218_v9  ;;  %v5399_v9 = vld [vmem:[#allocation8 + $0x68] sm:$0xff]  ;;  %v4470_v21 = vor.u32 %v5294_v17, %v4469_v16  ;;  %v5767_v60 = vld [vmem:[#allocation7] sm:$0x7f]  ;;  %v5424_v16 = vld [vmem:[#allocation8 + $0x130] sm:$0xff] }
 0x159   :  { %2849 = vmatpush.bf16.msrb.mxu3 %v3770_v10  ;;  %v4498_v10 = vor.u32 %v5301_v5, %v4497_v4  ;;  %v5417_v4 = vld [vmem:[#allocation8 + $0xf8] sm:$0xff]  ;;  %v5408_v5 = vld [vmem:[#allocation8 + $0xb0] sm:$0xff] }
 0x15a   :  { %2864 = vmatpush.bf16.msra.mxu0 %v3938_v35  ;;  %v5757_v20 = vpop.f32.mrf.mxu0 }
 0x15b   :  { %2838 = vmatpush.bf16.msra.mxu1 %v3490_v34  ;;  %v5280_v34 = vld [vmem:[#allocation5 + $0x768] sm:$0xf0] }
 0x15c   :  { %2876 = vmatpush.bf16.msrb.mxu2 %v4190_v26 }
 0x15d   :  { %2850 = vmatpush.bf16.msrb.mxu3 %v3742_v31  ;;  %2865 = vmatmul.bf16.vlgmr.msra.gmra.mxu0 %v5659_v53  ;;  %v4750_v53 = vor.u32 %v5364_v55, %v4749_v1  ;;  %v4665_v31 = vld [vmem:[#allocation5 + $0x948] sm:$0xf]  ;;  %v2922_v1 = vmax.f32 %v5710_v30, 0.0  ;;  %v2923_v55 = vmax.f32 %v5726_v51, 0.0 }
 0x15e   :  { %2916 = vmatpush.bf16.msrb.mxu0 %v4834_v40  ;;  %2839 = vmatmul.bf16.vlgmr.msra.gmra.mxu1 %v5662_v12  ;;  %v5390_v12 = vld [vmem:[#allocation8 + $0x20] sm:$0xff]  ;;  %v4666_v7 = vor.u32 %v5343_v8, %v4665_v31  ;;  %v4414_v40 = vor.u32 %v5280_v34, %v4413_v32  ;;  %v5407_v30 = vld [vmem:[#allocation8 + $0xa8] sm:$0xff]  ;;  %v5420_v31 = vld [vmem:[#allocation8 + $0x110] sm:$0xff] }
 0x15f   :  { %2883 = vmatpush.bf16.msrb.mxu1 %v4582_v39  ;;  %v2595_v14 = vpop.f32.mrf.mxu1  ;;  %v5396_v39 = vld [vmem:[#allocation8 + $0x50] sm:$0xff]  ;;  %v5411_v32 = vld [vmem:[#allocation8 + $0xc8] sm:$0xff]  ;;  %v5402_v34 = vld [vmem:[#allocation8 + $0x80] sm:$0xff] }
 0x160   :  { %2877 = vmatpush.bf16.msrb.mxu2 %v4162_v43  ;;  %v5404_v14 = vld [vmem:[#allocation8 + $0x90] sm:$0xff] }
 0x161   :  { %2851 = vmatpush.bf16.msrb.mxu3 %v3714_v47  ;;  %v4638_v47 = vor.u32 %v5336_v42, %v4637_v41  ;;  %v507_v41 = vperm.slane %v5767_v60, 4  ;;  %v5410_v42 = vld [vmem:[#allocation8 + $0xc0] sm:$0xff] }
 0x162   :  { %3356 = vmatpush.bf16.msra.mxu0 %v5401_v50  ;;  %v5761_v57 = vpop.f32.mrf.mxu2  ;;  %v2634_v35 = vpop.f32.mrf.mxu0  ;;  %v5395_v50 = vld [vmem:[#allocation8 + $0x48] sm:$0xff] }
 0x163   :  { %2884 = vmatpush.bf16.msrb.mxu1 %v4554_v52  ;;  %2878 = vmatmul.bf16.vlgmr.msrb.gmra.mxu2 %v5664_v18  ;;  %v5398_v18 = vld [vmem:[#allocation8 + $0x60] sm:$0xff]  ;;  %v5759_v26 = vpop.f32.mrf.mxu3  ;;  %v4386_v52 = vor.u32 %v5273_v46, %v4385_v44 }
 0x164   :  { %3343 = vmatpush.bf16.msra.mxu2 %v5393_v49  ;;  %2852 = vmatmul.bf16.vlgmr.msrb.gmra.mxu3 %v5666_v19  ;;  %v4722_v19 = vor.u32 %v5357_v15, %v4721_v13  ;;  %v2930_v13 = vpack.c.bf16 %v2923_v55, %v2923_v55  ;;  %v5416_v15 = vld [vmem:[#allocation8 + $0xf0] sm:$0xff] }
 0x165   :  { %2896 = vmatpush.bf16.msra.mxu3 %v4806_v48  ;;  %v5387_v48 = vld [vmem:[#allocation8 + $0x8] sm:$0xff] }
 0x166   :  { %3357 = vmatpush.bf16.msra.mxu0 %v5400_v63  ;;  %v5386_v63 = vld [vmem:[#allocation8] sm:$0xff] }
 0x167   :  { %2885 = vmatpush.bf16.msrb.mxu1 %v4526_v0  ;;  %v5765_v43 = vpop.f32.mrf.mxu1  ;;  %v5394_v0 = vld [vmem:[#allocation8 + $0x40] sm:$0xff] }
 0x168   :  { %3344 = vmatpush.bf16.msra.mxu2 %v5392_v62  ;;  %v4610_v62 = vor.u32 %v5329_v58, %v4609_v54 }
 0x169   :  { %2897 = vmatpush.bf16.msra.mxu3 %v4778_v61  ;;  %v506_v61 = vperm.slane %v5767_v60, 3 }
 0x16a   :  { %3358 = vmatpush.bf16.msra.mxu0 %v5399_v9  ;;  %v2621_v49 = vpop.f32.mrf.mxu2  ;;  %v5425_v9 = vld [vmem:[#allocation8 + $0x138] sm:$0xff] }
 0x16b   :  { %2886 = vmatpush.bf16.msrb.mxu1 %v4498_v10  ;;  %v2929_v10 = vpack.c.bf16 %v2922_v1, %v2922_v1 }
 0x16c   :  { %3345 = vmatpush.bf16.msra.mxu2 %v5391_v6  ;;  %v2568_v6 = vadd.f32 %v5744_v56, %v506_v61  ;;  %v5406_v56 = vld [vmem:[#allocation8 + $0xa0] sm:$0xff] }
 0x16d   :  { %2898 = vmatpush.bf16.msra.mxu3 %v4750_v53  ;;  %4841 = vmatmul.msk.bf16.vlgmr.msrb.gmra.mxu0 %vm2281_vm0, %v5671_v45  ;;  %v2608_v45 = vpop.f32.mrf.mxu3 }
 0x16e   :  { %3359 = vmatpush.bf16.msra.mxu0 %v5398_v18  ;;  %v2581_v51 = vadd.f32 %v5742_v36, %v2568_v6  ;;  %v5414_v18 = vld [vmem:[#allocation8 + $0xe0] sm:$0xff] }
 0x16f   :  { %2887 = vmatpush.bf16.msrb.mxu1 %v4470_v21  ;;  %v2647_v53 = vpop.f32.mrf.mxu1  ;;  %v5405_v21 = vld [vmem:[#allocation8 + $0x98] sm:$0xff] }
 0x170   :  { %3346 = vmatpush.bf16.msra.mxu2 %v5390_v12  ;;  %v2594_v17 = vadd.f32 %v5752_v3, %v2581_v51  ;;  %v5429_v53 = vld [vmem:[#allocation8 + $0x158] sm:$0xff]  ;;  %v5426_v51 = vld [vmem:[#allocation8 + $0x140] sm:$0xff] }
 0x171   :  { %2899 = vmatpush.bf16.msra.mxu3 %v4722_v19  ;;  %v5423_v19 = vld [vmem:[#allocation8 + $0x128] sm:$0xff] }
 0x172   :  { %3360 = vmatpush.bf16.msra.mxu0 %v5397_v29  ;;  %v2607_v36 = vadd.f32 %v5759_v26, %v2594_v17  ;;  %v5412_v29 = vld [vmem:[#allocation8 + $0xd0] sm:$0xff] }
 0x173   :  { %2888 = vmatpush.bf16.msrb.mxu1 %v4442_v11  ;;  %v5403_v11 = vld [vmem:[#allocation8 + $0x88] sm:$0xff] }
 0x174   :  { %3347 = vmatpush.bf16.msra.mxu2 %v5389_v28  ;;  %v2620_v3 = vadd.f32 %v5761_v57, %v2607_v36  ;;  %v2924_v57 = vmax.f32 %v5749_v2, 0.0 }
 0x175   :  { %2900 = vmatpush.bf16.msra.mxu3 %v4694_v27  ;;  %v5421_v27 = vld [vmem:[#allocation8 + $0x118] sm:$0xff] }
 0x176   :  { %3361 = vmatpush.bf16.msra.mxu0 %v5396_v39  ;;  %v2633_v26 = vadd.f32 %v5757_v20, %v2620_v3  ;;  %v5432_v20 = vld [vmem:[#allocation8 + $0x170] sm:$0xff]  ;;  %v2931_v44 = vpack.c.bf16 %v2924_v57, %v2924_v57 }
 0x177   :  { %2889 = vmatpush.bf16.msrb.mxu1 %v4414_v40  ;;  %v5419_v40 = vld [vmem:[#allocation8 + $0x108] sm:$0xff] }
 0x178   :  { %3348 = vmatpush.bf16.msra.mxu2 %v5388_v37  ;;  %v5433_v37 = vld [vmem:[#allocation8 + $0x178] sm:$0xff]  ;;  %v2646_v39 = vadd.f32 %v5765_v43, %v2633_v26 }
 0x179   :  { %2901 = vmatpush.bf16.msra.mxu3 %v4666_v7 }
 0x17a   :  { %3362 = vmatpush.bf16.msra.mxu0 %v5395_v50  ;;  %v2697_v22 = vpop.f32.mrf.mxu0  ;;  %v2925_v46 = vmax.f32 %v2646_v39, 0.0  ;;  %v509_v39 = vperm.slane %v5767_v60, 6 }
 0x17b   :  { %2890 = vmatpush.bf16.msrb.mxu1 %v4386_v52  ;;  %v2671_v12 = vpop.f32.mrf.mxu1 }
 0x17c   :  { %3349 = vmatpush.bf16.msra.mxu2 %v5387_v48  ;;  %v2932_v45 = vpack.c.bf16 %v2925_v46, %v2925_v46 }
 0x17d   :  { %2902 = vmatpush.bf16.msra.mxu3 %v4638_v47  ;;  %v5418_v47 = vld [vmem:[#allocation8 + $0x100] sm:$0xff] }
 0x17e   :  { %2891 = vmatmul.bf16.vlgmr.msrb.gmra.mxu1 %v5675_v33  ;;  %3363 = vmatpush.bf16.msra.mxu0 %v5394_v0  ;;  %v5415_v33 = vld [vmem:[#allocation8 + $0xe8] sm:$0xff] }
 0x17f   :  { %3369 = vmatpush.bf16.msra.mxu1 %v5409_v59  ;;  %v5431_v59 = vld [vmem:[#allocation8 + $0x168] sm:$0xff] }
 0x180   :  { %3350 = vmatpush.bf16.msra.mxu2 %v5386_v63 }
 0x181   :  { %2903 = vmatpush.bf16.msra.mxu3 %v4610_v62  ;;  %3364 = vmatmul.bf16.vlgmr.msra.gmra.mxu0 %v2930_v13  ;;  %v5430_v62 = vld [vmem:[#allocation8 + $0x160] sm:$0xff] }
 0x182   :  { %v2684_v25 = vpop.f32.mrf.mxu2  ;;  %v2699_v8 = vpop.f32.mrf.mxu0  ;;  %3408 = vmatpush.bf16.msrb.mxu0 %v5433_v37  ;;  %v5434_v37 = vld [vmem:[#allocation8 + $0x180] sm:$0xff] }
 0x183   :  { %3370 = vmatpush.bf16.msra.mxu1 %v5408_v5  ;;  %3351 = vmatmul.bf16.vlgmr.msra.gmra.mxu2 %v2929_v10  ;;  %v2658_v24 = vpop.f32.mrf.mxu3  ;;  %v2673_v28 = vpop.f32.mrf.mxu1 }
 0x184   :  { %2904 = vmatmul.bf16.vlgmr.msra.gmra.mxu3 %v5677_v38  ;;  %3395 = vmatpush.bf16.msrb.mxu2 %v5425_v9  ;;  %v5422_v38 = vld [vmem:[#allocation8 + $0x120] sm:$0xff]  ;;  %v2659_v48 = vadd.f32 %v2658_v24, %v507_v41  ;;  %v5428_v9 = vld [vmem:[#allocation8 + $0x150] sm:$0xff] }
 0x185   :  { %3382 = vmatpush.bf16.msrb.mxu3 %v5417_v4 }
 0x186   :  { %3409 = vmatpush.bf16.msrb.mxu0 %v5432_v20  ;;  %v2672_v43 = vadd.f32 %v2671_v12, %v2659_v48 }
 0x187   :  { %3371 = vmatpush.bf16.msra.mxu1 %v5407_v30  ;;  %v5427_v30 = vld [vmem:[#allocation8 + $0x148] sm:$0xff] }
 0x188   :  { %3396 = vmatpush.bf16.msrb.mxu2 %v5424_v16  ;;  %v2685_v49 = vadd.f32 %v2684_v25, %v2672_v43  ;;  %v508_v16 = vperm.slane %v5767_v60, 5 }
 0x189   :  { %3383 = vmatpush.bf16.msrb.mxu3 %v5416_v15 }
 0x18a   :  { %v2686_v7 = vpop.f32.mrf.mxu2  ;;  %v2698_v58 = vadd.f32 %v2697_v22, %v2685_v49  ;;  %3410 = vmatpush.bf16.msrb.mxu0 %v5431_v59 }
 0x18b   :  { %3372 = vmatpush.bf16.msra.mxu1 %v5406_v56  ;;  %v2660_v35 = vpop.f32.mrf.mxu3 }
 0x18c   :  { %3397 = vmatpush.bf16.msrb.mxu2 %v5423_v19 }
 0x18d   :  { %3384 = vmatpush.bf16.msrb.mxu3 %v5415_v33 }
 0x18e   :  { %3411 = vmatpush.bf16.msrb.mxu0 %v5430_v62 }
 0x18f   :  { %3373 = vmatpush.bf16.msra.mxu1 %v5405_v21 }
 0x190   :  { %3398 = vmatpush.bf16.msrb.mxu2 %v5422_v38 }
 0x191   :  { %3385 = vmatpush.bf16.msrb.mxu3 %v5414_v18 }
 0x192   :  { %v2736_v2 = vpop.f32.mrf.mxu2  ;;  %3412 = vmatpush.bf16.msrb.mxu0 %v5429_v53 }
 0x193   :  { %3374 = vmatpush.bf16.msra.mxu1 %v5404_v14 }
 0x194   :  { %3399 = vmatpush.bf16.msrb.mxu2 %v5421_v27 }
 0x195   :  { %3386 = vmatpush.bf16.msrb.mxu3 %v5413_v23 }
 0x196   :  { %3413 = vmatpush.bf16.msrb.mxu0 %v5428_v9 }
 0x197   :  { %3375 = vmatpush.bf16.msra.mxu1 %v5403_v11  ;;  %v5435_v11 = vld [vmem:[#allocation8 + $0x188] sm:$0xff] }
 0x198   :  { %3400 = vmatpush.bf16.msrb.mxu2 %v5420_v31 }
 0x199   :  { %3387 = vmatpush.bf16.msrb.mxu3 %v5412_v29 }
 0x19a   :  { %v2738_v52 = vpop.f32.mrf.mxu2  ;;  %v2749_v54 = vpop.f32.mrf.mxu0  ;;  %3414 = vmatpush.bf16.msrb.mxu0 %v5427_v30 }
 0x19b   :  { %3376 = vmatpush.bf16.msra.mxu1 %v5402_v34  ;;  %v2723_v50 = vpop.f32.mrf.mxu1  ;;  %v2750_v33 = vadd.f32 %v2749_v54, %v508_v16 }
 0x19c   :  { %3401 = vmatpush.bf16.msrb.mxu2 %v5419_v40 }
 0x19d   :  { %3388 = vmatpush.bf16.msrb.mxu3 %v5411_v32 }
 0x19e   :  { %3377 = vmatmul.bf16.vlgmr.msra.gmra.mxu1 %v2931_v44  ;;  %3415 = vmatpush.bf16.msrb.mxu0 %v5426_v51 }
 0x19f   :  { %3427 = vmatpush.bf16.msrb.mxu1 %v5435_v11 }
 0x1a0   :  { %3402 = vmatpush.bf16.msrb.mxu2 %v5418_v47 }
 0x1a1   :  { %3389 = vmatpush.bf16.msrb.mxu3 %v5410_v42 }
 0x1a2   :  { %v2751_v4 = vpop.f32.mrf.mxu0 }
 0x1a3   :  { %v2710_v61 = vpop.f32.mrf.mxu3  ;;  %v2725_v1 = vpop.f32.mrf.mxu1  ;;  %3428 = vmatpush.bf16.msrb.mxu1 %v5434_v37 }
 0x1a4   :  { %3390 = vmatmul.bf16.vlgmr.msrb.gmra.mxu3 %v2932_v45  ;;  %v2711_v63 = vadd.f32 %v2710_v61, %v2698_v58  ;;  %v5446_v45 = vld [vmem:[#allocation10] ss:$0 sm:$0xff] }
 0x1a6   :  { %v2724_v0 = vadd.f32 %v2723_v50, %v2711_v63  ;;  %v2762_v55 = vpop.f32.mrf.mxu2 }
 0x1a7   :  { %v2763_v19 = vadd.f32 %v2762_v55, %v2750_v33 }
 0x1a8   :  { %v2737_v5 = vadd.f32 %v2736_v2, %v2724_v0 }
 0x1aa   :  { %v2926_v6 = vmax.f32 %v2737_v5, 0.0 }
 0x1ab   :  { %v2712_v10 = vpop.f32.mrf.mxu3 }
 0x1ac   :  { %v2933_v13 = vpack.c.bf16 %v2926_v6, %v2926_v6 }
 0x1ae   :  { %3403 = vmatmul.bf16.vlgmr.msrb.gmra.mxu2 %v2933_v13  ;;  %v2764_v15 = vpop.f32.mrf.mxu2 }
 0x1ba   :  { %v2801_v17 = vpop.f32.mrf.mxu0 }
 0x1bb   :  { %v2788_v56 = vpop.f32.mrf.mxu1 }
 0x1c2   :  { %v2803_v38 = vpop.f32.mrf.mxu0 }
 0x1c3   :  { %v2775_v12 = vpop.f32.mrf.mxu3  ;;  %v2790_v36 = vpop.f32.mrf.mxu1 }
 0x1c4   :  { %v2776_v18 = vadd.f32 %v2775_v12, %v2763_v19 }
 0x1c6   :  { %v2814_v21 = vpop.f32.mrf.mxu2  ;;  %v2789_v22 = vadd.f32 %v2788_v56, %v2776_v18 }
 0x1c8   :  { %v2802_v14 = vadd.f32 %v2801_v17, %v2789_v22 }
 0x1ca   :  { %v2815_v25 = vadd.f32 %v2814_v21, %v2802_v14 }
 0x1cb   :  { %v2777_v23 = vpop.f32.mrf.mxu3 }
 0x1ce   :  { %v2816_v24 = vpop.f32.mrf.mxu2 }
 0x1d3   :  { %v2827_v3 = vpop.f32.mrf.mxu3 }
 0x1d4   :  { %v2828_v27 = vadd.f32 %v2827_v3, %v2815_v25 }
 0x1d6   :  { %v2927_v28 = vmax.f32 %v2828_v27, 0.0 }
 0x1d8   :  { %v2934_v29 = vpack.c.bf16 %v2927_v28, %v2927_v28 }
 0x1da   :  { %3416 = vmatmul.bf16.vlgmr.msrb.gmra.mxu0 %v2934_v29  ;;  %v2866_v26 = vpop.f32.mrf.mxu0 }
 0x1db   :  { %v2829_v31 = vpop.f32.mrf.mxu3  ;;  %v2840_v8 = vpop.f32.mrf.mxu1 }
 0x1dc   :  { %v2841_v20 = vadd.f32 %v2840_v8, %v509_v39 }
 0x1e2   :  { %v2868_v32 = vpop.f32.mrf.mxu0 }
 0x1e3   :  { %v2842_v7 = vpop.f32.mrf.mxu1 }
 0x1e6   :  { %v2879_v35 = vpop.f32.mrf.mxu2 }
 0x1e7   :  { %v2853_v34 = vpop.f32.mrf.mxu3 }
 0x1e8   :  { %v2854_v44 = vadd.f32 %v2853_v34, %v2841_v20 }
 0x1ea   :  { %v2918_v57 = vpop.f32.mrf.mxu0  ;;  %v2867_v46 = vadd.f32 %v2866_v26, %v2854_v44 }
 0x1ec   :  { %v2880_v48 = vadd.f32 %v2879_v35, %v2867_v46 }
 0x1ee   :  { %v2881_v41 = vpop.f32.mrf.mxu2 }
 0x1ef   :  { %v2855_v40 = vpop.f32.mrf.mxu3 }
 0x1f2   :  { %v2920_v42 = vpop.f32.mrf.mxu0 }
 0x1fb   :  { %v2892_v47 = vpop.f32.mrf.mxu1 }
 0x1fc   :  { %v2893_v43 = vadd.f32 %v2892_v47, %v2880_v48 }
 0x1fe   :  { %v3365_v2 = vpop.f32.mrf.mxu0 }
 0x203   :  { %v2894_v49 = vpop.f32.mrf.mxu1 }
 0x206   :  { %v3352_v54 = vpop.f32.mrf.mxu2  ;;  %v3367_v61 = vpop.f32.mrf.mxu0 }
 0x207   :  { %v2905_v50 = vpop.f32.mrf.mxu3  ;;  %v3353_v58 = vadd.f32 %v5446_v45, %v3352_v54 }
 0x208   :  { %v2906_v52 = vadd.f32 %v2905_v50, %v2893_v43 }
 0x209   :  { %v3366_v62 = vadd.f32 %v3365_v2, %v3353_v58 }
 0x20a   :  { %v2919_v59 = vadd.f32 %v2918_v57, %v2906_v52 }
 0x20c   :  { %v2928_v60 = vmax.f32 %v2919_v59, 0.0 }
 0x20e   :  { %v2935_v63 = vpack.c.bf16 %v2928_v60, %v2928_v60  ;;  %v3354_v1 = vpop.f32.mrf.mxu2 }
 0x20f   :  { %v2907_v0 = vpop.f32.mrf.mxu3 }
 0x210   :  { %5042 = vmatmul.msk.bf16.vlgmr.msrb.gmra.mxu1 %vm3339_vm1, %v2935_v63 }
 0x21b   :  { %v3378_v55 = vpop.f32.mrf.mxu1 }
 0x21c   :  { %v3379_v4 = vadd.f32 %v3378_v55, %v3366_v62 }
 0x223   :  { %v3380_v5 = vpop.f32.mrf.mxu1 }
 0x227   :  { %v3391_v53 = vpop.f32.mrf.mxu3 }
 0x228   :  { %v3392_v6 = vadd.f32 %v3391_v53, %v3379_v4 }
 0x22f   :  { %v3393_v9 = vpop.f32.mrf.mxu3 }
 0x231   :  { %v3404_v10 = vpop.f32.mrf.mxu2 }
 0x232   :  { %v3405_v13 = vadd.f32 %v3404_v10, %v3392_v6 }
 0x239   :  { %v3406_v15 = vpop.f32.mrf.mxu2 }
 0x257   :  { %v3417_v30 = vpop.f32.mrf.mxu0 }
 0x258   :  { %v3418_v16 = vadd.f32 %v3417_v30, %v3405_v13 }
 0x25f   :  { %v3419_v51 = vpop.f32.mrf.mxu0 }
 0x28d   :  { %v3430_v33 = vpop.f32.mrf.mxu1 }
 0x28e   :  { %v3431_v56 = vadd.f32 %v3430_v33, %v3418_v16 }
 0x290   :  { %3434 = vmax.xlane.f32.xlu0 %v3431_v56 }
 0x295   :  { %v3432_v17 = vpop.f32.mrf.mxu1 }
 0x303   :  { %v3435_v19 = vpop.xlane.xlu0 %3434 }
 0x304   :  { %v3436_v12 = vsub.f32 %v3431_v56, %v3435_v19 }
 0x306   :  { %v3437_v18 = vmul.f32 1.442695, %v3436_v12 }
 0x308   :  { %5447 = vpow2.f32 %v3437_v18 }
 0x30e   :  { %v5448_v21 = vpop.eup %5447 }
 0x30f   :  { %3439 = vadd.xlane.f32.xlu0 %v5448_v21 }
 0x382   :  { %v3440_v36 = vpop.xlane.xlu0 %3439 }
 0x383   :  { %5449 = vrcp.f32 %v3440_v36 }
 0x389   :  { %v5450_v38 = vpop.eup %5449 }
 0x38a   :  { %v3442_v22 = vmul.f32 %v5450_v38, %v5448_v21 }
 0x38c   :  { %3443 = vst [vmem:[#allocation11] sm:$0xff] %v3442_v22 }
 0x38d   :  { %3454 = dma.vmem_to_hbm [thread:$0]  %s3450_s4, 128, %s3452_s21, [#allocation4]  }
 0x38e   :  { %5602 = dma.done.wait [#allocation4], 128  }
 0x38f   :  { %5603 = vsyncadd [#allocation4], 4294967168 }
 0x390   :  { %3459 = vsyncpa [#allocation3], 1 }
 0x391   :  { %3460 = vsyncpa [#allocation6], 1 }
 0x392   :  { %3461 = vsyncpa [#allocation9], 1 }
 0x393   :  { %3462 = vsyncpa [#allocation4], 1 }

</bundles_post_ra>
